<compile_context>
chip_gen: v7x
topology: tpu7x:2x2x1
jax: 0.10.0
libtpu: 0.0.40
codegen_flags: <defaults>
</compile_context>

<pallas_src>
import jax
import jax.numpy as jnp
from jax.experimental import pallas as pl
from jax.experimental.pallas import tpu as pltpu

# ---- model hyper-parameters (consistent with the module __init__) ----
FIELD_DIMS = (5, 7, 4, 6)            # field_dims
EMBED_DIM = 8                        # embed_dim
NUM_FIELDS = len(FIELD_DIMS)
VOCAB = sum(FIELD_DIMS)              # 22 (single embedding table, offset indexed)
D0 = NUM_FIELDS * EMBED_DIM          # concat_embed_dim = 32
HIDDEN_DIMS = (32, 16)               # hidden_dims
H1, H2 = HIDDEN_DIMS
NUM_CN_LAYERS = 3                    # num_cn_layer
OUT_DIM = 1                          # out_dim (mode='binary')
BN_EPS = 1e-5

_OFFSETS = tuple([0] + [sum(FIELD_DIMS[:i]) for i in range(1, NUM_FIELDS)])
# per-field shift into the block-diagonal embedding map (compile-time constants)
_SHIFTS = tuple(_OFFSETS[f] + f * VOCAB for f in range(NUM_FIELDS))

# ---- tiling ----
TILE_B = 1024                        # batch rows per grid step (sweep 512/1024/2048)

# ---- packed-parameter layout: one (272, 128) f32 buffer, 8-aligned row blocks ----
_R_W2 = 0                            # (H1, H2)        MLP layer 2 weight (BN folded)
_R_CWT = 32                          # (D0, L)         cross weights, column i = cw[i]
_R_WFCN = 64                         # (D0, 1)         final linear, cross half
_R_WFMLP = 96                        # (H2, 1)         final linear, MLP half
_R_B1 = 112                          # (1, H1)         MLP layer 1 bias (BN folded)
_R_B2 = 120                          # (1, H2)         MLP layer 2 bias (BN folded)
_R_BF = 128                          # (1, 1)          final bias
_R_CB = 136                          # (L, D0)         cross biases
_R_TAB = 144                         # (ONEHOT_W, 65)  [table | table@w1 | table@cw0]
ONEHOT_W = 128                       # F * VOCAB = 88, padded to a full lane width
FUSED_N = D0 + H1 + 1                # 65 fused gather-matmul output columns
PACK_ROWS = _R_TAB + ONEHOT_W        # 272 (multiple of 8)
PACK_LANES = 128


def dcn_kernel(idx_ref, p_ref, out_ref):
    tb = idx_ref.shape[0]

    # ---- in-kernel embedding gather (one-hot @ block-diagonal map on the MXU) ----
    # Field bands in the map are disjoint, so the 4 equality masks are OR-ed and
    # converted once.  The per-field offset shift is a compile-time constant.
    idx = idx_ref[...]                                            # (T, F) int32
    iota = jax.lax.broadcasted_iota(jnp.int32, (tb, ONEHOT_W), 1)
    mask = iota == (idx[:, 0:1] + _SHIFTS[0])
    for f in range(1, NUM_FIELDS):
        mask = jnp.logical_or(mask, iota == (idx[:, f:f + 1] + _SHIFTS[f]))
    onehot = mask.astype(jnp.float32)                             # (T, 128)

    # Fused gather: one dot yields x, the layer-1 pre-activation, and x . cw_0.
    tab = p_ref[_R_TAB:_R_TAB + ONEHOT_W, 0:FUSED_N]              # (128, 65)
    fused = jnp.dot(onehot, tab, preferred_element_type=jnp.float32)   # (T, 65)
    x = fused[:, 0:D0]                                            # (T, D0)
    h1 = fused[:, D0:D0 + H1]                                     # x @ w1 (pre-bias)
    xw0 = fused[:, D0 + H1:FUSED_N]                               # (T, 1) = x . cw_0

    # ---- deep branch: (folded BN) Linear -> ReLU, twice (dropout = identity) ----
    b1 = p_ref[_R_B1:_R_B1 + 1, 0:H1]
    h = jnp.maximum(h1 + b1, 0.0)
    w2 = p_ref[_R_W2:_R_W2 + H1, 0:H2]
    b2 = p_ref[_R_B2:_R_B2 + 1, 0:H2]
    h = jnp.maximum(jnp.dot(h, w2, preferred_element_type=jnp.float32) + b2, 0.0)

    # ---- cross branch: x_{i+1} = x0 * (x_i . w_i) + b_i + x_i (dot on MXU) ----
    cwt = p_ref[_R_CWT:_R_CWT + D0, 0:NUM_CN_LAYERS]              # (D0, L)
    cb = p_ref[_R_CB:_R_CB + NUM_CN_LAYERS, 0:D0]                 # (L, D0)
    xc = x * xw0 + cb[0:1, :] + x                                 # layer 0 fused above
    for i in range(1, NUM_CN_LAYERS):                             # static unroll
        xw = jnp.dot(xc, cwt[:, i:i + 1], preferred_element_type=jnp.float32)  # (T, 1)
        xc = x * xw + cb[i:i + 1, :] + xc

    # ---- final linear on concat([y_cn, y_mlp]) + sigmoid ----
    wf_cn = p_ref[_R_WFCN:_R_WFCN + D0, 0:OUT_DIM]
    wf_mlp = p_ref[_R_WFMLP:_R_WFMLP + H2, 0:OUT_DIM]
    bf = p_ref[_R_BF:_R_BF + 1, 0:OUT_DIM]
    y = (jnp.dot(xc, wf_cn, preferred_element_type=jnp.float32)
         + jnp.dot(h, wf_mlp, preferred_element_type=jnp.float32)
         + bf)                                                    # (T, 1)
    # exp + approximate reciprocal both land on the (otherwise idle) EUP slot.
    out_ref[...] = pl.reciprocal(1.0 + jnp.exp(-y), approx=True)


# ----------------------------- parameters ----------------------------------
def init_params(key):
    ks = jax.random.split(key, 16)
    p = {}
    p["embed_table"] = 0.1 * jax.random.normal(ks[0], (VOCAB, EMBED_DIM), jnp.float32)
    p["w1"] = 0.1 * jax.random.normal(ks[1], (D0, H1), jnp.float32)
    p["b1"] = 0.1 * jax.random.normal(ks[2], (1, H1), jnp.float32)
    p["bn1"] = dict(gamma=1.0 + 0.1 * jax.random.normal(ks[3], (H1,), jnp.float32),
                    beta=0.1 * jax.random.normal(ks[4], (H1,), jnp.float32),
                    mean=0.1 * jax.random.normal(ks[5], (H1,), jnp.float32),
                    var=1.0 + 0.1 * jax.random.uniform(ks[6], (H1,), jnp.float32))
    p["w2"] = 0.1 * jax.random.normal(ks[7], (H1, H2), jnp.float32)
    p["b2"] = 0.1 * jax.random.normal(ks[8], (1, H2), jnp.float32)
    p["bn2"] = dict(gamma=1.0 + 0.1 * jax.random.normal(ks[9], (H2,), jnp.float32),
                    beta=0.1 * jax.random.normal(ks[10], (H2,), jnp.float32),
                    mean=0.1 * jax.random.normal(ks[11], (H2,), jnp.float32),
                    var=1.0 + 0.1 * jax.random.uniform(ks[12], (H2,), jnp.float32))
    p["cw"] = 0.1 * jax.random.normal(ks[13], (NUM_CN_LAYERS, D0), jnp.float32)
    p["cb"] = jnp.zeros((NUM_CN_LAYERS, D0), jnp.float32)         # torch.zeros init
    wf = 0.1 * jax.random.normal(ks[14], (D0 + H2, OUT_DIM), jnp.float32)
    p["wf_cn"] = wf[:D0]
    p["wf_mlp"] = wf[D0:]
    p["bf"] = 0.1 * jax.random.normal(ks[15], (1, OUT_DIM), jnp.float32)
    return p


def _fold_bn(w, b, bn):
    """Fold eval-mode BatchNorm1d into the preceding Linear: y = x @ w' + b'."""
    s = bn["gamma"] * jax.lax.rsqrt(bn["var"] + BN_EPS)
    t = bn["beta"] - bn["mean"] * s
    return w * s[None, :], b * s[None, :] + t[None, :]


def pack_params(params):
    """Pack all (BN-folded) weights + fused embedding map into one (272, 128) buffer."""
    w1, b1 = _fold_bn(params["w1"], params["b1"], params["bn1"])
    w2, b2 = _fold_bn(params["w2"], params["b2"], params["bn2"])

    def put(buf, row, a):
        return buf.at[row:row + a.shape[0], 0:a.shape[1]].set(a)

    buf = jnp.zeros((PACK_ROWS, PACK_LANES), jnp.float32)
    buf = put(buf, _R_W2, w2)
    buf = put(buf, _R_CWT, params["cw"].T)          # (D0, L)
    buf = put(buf, _R_WFCN, params["wf_cn"])
    buf = put(buf, _R_WFMLP, params["wf_mlp"])
    buf = put(buf, _R_B1, b1)
    buf = put(buf, _R_B2, b2)
    buf = put(buf, _R_BF, params["bf"])
    buf = put(buf, _R_CB, params["cb"])
    # Block-diagonal embedding map: global row f*VOCAB + g -> cols f*E:(f+1)*E.
    tab = jnp.zeros((ONEHOT_W, D0), jnp.float32)
    for f in range(NUM_FIELDS):
        tab = tab.at[f * VOCAB:(f + 1) * VOCAB,
                     f * EMBED_DIM:(f + 1) * EMBED_DIM].set(params["embed_table"])
    # Fuse layer-1 weight and the first cross weight into the gather matmul RHS.
    hi = jax.lax.Precision.HIGHEST
    tab_w1 = jnp.dot(tab, w1, precision=hi)                       # (128, H1)
    tab_cw0 = jnp.dot(tab, params["cw"][0][:, None], precision=hi)  # (128, 1)
    tab_ext = jnp.concatenate([tab, tab_w1, tab_cw0], axis=1)     # (128, 65)
    buf = put(buf, _R_TAB, tab_ext)
    return buf


# ----------------------------- forward --------------------------------------
def _round_up(a, m):
    return (a + m - 1) // m * m


def _pick_tile(batch):
    """Largest tile <= TILE_B that still leaves >=2 grid steps (v7x megacore)."""
    b128 = _round_up(batch, 128)
    tile = min(TILE_B, b128)
    if b128 > 128 and b128 // tile < 2:
        tile = max(128, _round_up(tile // 2, 128))
    return tile


@jax.jit
def dcn_forward(x_idx, packed):
    b = x_idx.shape[0]
    tile = _pick_tile(b)                      # static per trace
    grid_n = pl.cdiv(b, tile)                 # ragged last block: OOB input rows only
                                              # feed integer compares in the kernel.
    cp_kwargs = dict(dimension_semantics=("parallel",))
    if tile >= 4096:                          # only needed for very large tiles
        cp_kwargs["vmem_limit_bytes"] = 48 * 1024 * 1024

    out = pl.pallas_call(
        dcn_kernel,
        out_shape=jax.ShapeDtypeStruct((grid_n * tile, OUT_DIM), jnp.float32),
        grid=(grid_n,),
        in_specs=[
            pl.BlockSpec((tile, NUM_FIELDS), lambda i: (i, 0)),        # batch-tiled raw indices
            pl.BlockSpec((PACK_ROWS, PACK_LANES), lambda i: (0, 0)),   # resident packed params
        ],
        out_specs=pl.BlockSpec((tile, OUT_DIM), lambda i: (i, 0)),
        compiler_params=pltpu.CompilerParams(**cp_kwargs),
    )(x_idx.astype(jnp.int32), packed)
    return out[:b, 0]                                            # sigmoid(y).squeeze(1)


def dcn_reference(x_idx, params):
    """Pure-JAX reference reproducing the PyTorch forward (eval mode, unfolded BN)."""
    offsets = jnp.asarray(_OFFSETS, jnp.int32)
    x = jnp.take(params["embed_table"], x_idx + offsets[None, :],
                 axis=0).reshape(x_idx.shape[0], D0)

    def bn(h, bnp):
        s = bnp["gamma"] / jnp.sqrt(bnp["var"] + BN_EPS)
        return (h - bnp["mean"]) * s + bnp["beta"]

    h = jnp.maximum(bn(x @ params["w1"] + params["b1"], params["bn1"]), 0.0)
    h = jnp.maximum(bn(h @ params["w2"] + params["b2"], params["bn2"]), 0.0)
    xc = x
    for i in range(NUM_CN_LAYERS):
        xw = jnp.sum(xc * params["cw"][i][None, :], axis=-1, keepdims=True)
        xc = x * xw + params["cb"][i][None, :] + xc
    y = xc @ params["wf_cn"] + h @ params["wf_mlp"] + params["bf"]
    return jax.nn.sigmoid(y[:, 0])


if __name__ == "__main__":
    key = jax.random.PRNGKey(0)
    kp, kx = jax.random.split(key)
    params = init_params(kp)
    packed = pack_params(params)

    BATCH = 200                       # deliberately not a multiple of the tile
    cols = [jax.random.randint(jax.random.fold_in(kx, f), (BATCH, 1), 0, fd, jnp.int32)
            for f, fd in enumerate(FIELD_DIMS)]
    x_idx = jnp.concatenate(cols, axis=1)        # (BATCH, NUM_FIELDS)

    out = jax.block_until_ready(dcn_forward(x_idx, packed))
    ref = dcn_reference(x_idx, params)
    assert out.shape == (BATCH,)
    # Tolerance accounts for the MXU's default-precision bf16 operand passes
    # (both paths) and the EUP approximate reciprocal in the sigmoid.
    assert jnp.allclose(out, ref, atol=2e-3, rtol=2e-3), (out, ref)
    print("KERNEL_OK")
</pallas_src>

<mosaic_0001>
module attributes {stable_mosaic.version = 11 : i64} {
  func.func @dcn_kernel(%arg0: i32, %arg1: memref<128x4xi32, #tpu.memory_space<vmem>>, %arg2: memref<272x128xf32, #tpu.memory_space<vmem>>, %arg3: memref<128x1xf32, #tpu.memory_space<vmem>>) attributes {dimension_semantics = [#tpu.dimension_semantics<parallel>], iteration_bounds = array<i64: 2>, scalar_prefetch = 0 : i64, scratch_operands = 0 : i64, tpu.core_type = #tpu.core_type<tc>, window_params = [{transform_indices = @transform_0, window_bounds = array<i64: 128, 4>}, {pipeline_mode = #tpu.pipeline_mode<synchronous>, transform_indices = @transform_1, window_bounds = array<i64: 272, 128>}, {transform_indices = @transform_2, window_bounds = array<i64: 128, 1>}]} {
    %c0 = arith.constant 0 : index
    %c0_0 = arith.constant 0 : index
    %0 = vector.load %arg1[%c0, %c0_0] : memref<128x4xi32, #tpu.memory_space<vmem>>, vector<128x4xi32>
    %1 = tpu.iota {dimensions = array<i32: 1>} : vector<128x128xi32>
    %2 = vector.extract_strided_slice %0 {offsets = [0, 0], sizes = [128, 1], strides = [1, 1]} : vector<128x4xi32> to vector<128x1xi32>
    %c0_i32 = arith.constant 0 : i32
    %3 = vector.broadcast %c0_i32 : i32 to vector<128x1xi32>
    %4 = arith.addi %2, %3 : vector<128x1xi32>
    %5 = vector.broadcast %4 : vector<128x1xi32> to vector<128x128xi32>
    %6 = arith.cmpi eq, %1, %5 : vector<128x128xi32>
    %7 = vector.extract_strided_slice %0 {offsets = [0, 1], sizes = [128, 1], strides = [1, 1]} : vector<128x4xi32> to vector<128x1xi32>
    %c27_i32 = arith.constant 27 : i32
    %8 = vector.broadcast %c27_i32 : i32 to vector<128x1xi32>
    %9 = arith.addi %7, %8 : vector<128x1xi32>
    %10 = vector.broadcast %9 : vector<128x1xi32> to vector<128x128xi32>
    %11 = arith.cmpi eq, %1, %10 : vector<128x128xi32>
    %12 = arith.ori %6, %11 : vector<128x128xi1>
    %13 = vector.extract_strided_slice %0 {offsets = [0, 2], sizes = [128, 1], strides = [1, 1]} : vector<128x4xi32> to vector<128x1xi32>
    %c56_i32 = arith.constant 56 : i32
    %14 = vector.broadcast %c56_i32 : i32 to vector<128x1xi32>
    %15 = arith.addi %13, %14 : vector<128x1xi32>
    %16 = vector.broadcast %15 : vector<128x1xi32> to vector<128x128xi32>
    %17 = arith.cmpi eq, %1, %16 : vector<128x128xi32>
    %18 = arith.ori %12, %17 : vector<128x128xi1>
    %19 = vector.extract_strided_slice %0 {offsets = [0, 3], sizes = [128, 1], strides = [1, 1]} : vector<128x4xi32> to vector<128x1xi32>
    %c82_i32 = arith.constant 82 : i32
    %20 = vector.broadcast %c82_i32 : i32 to vector<128x1xi32>
    %21 = arith.addi %19, %20 : vector<128x1xi32>
    %22 = vector.broadcast %21 : vector<128x1xi32> to vector<128x128xi32>
    %23 = arith.cmpi eq, %1, %22 : vector<128x128xi32>
    %24 = arith.ori %18, %23 : vector<128x128xi1>
    %25 = arith.extui %24 : vector<128x128xi1> to vector<128x128xi32>
    %26 = arith.sitofp %25 : vector<128x128xi32> to vector<128x128xf32>
    %c144 = arith.constant 144 : index
    %c0_1 = arith.constant 0 : index
    %27 = vector.load %arg2[%c144, %c0_1] : memref<272x128xf32, #tpu.memory_space<vmem>>, vector<128x65xf32>
    %cst = arith.constant dense<0.000000e+00> : vector<128x65xf32>
    %28 = tpu.matmul %26, %27, %cst {dimension_numbers = #tpu.dot_dimension_numbers<[1], [0], [0], [1], [0, 0, 1, 1], [], []>} : vector<128x128xf32>, vector<128x65xf32>, vector<128x65xf32> -> vector<128x65xf32>
    %29 = vector.extract_strided_slice %28 {offsets = [0, 0], sizes = [128, 32], strides = [1, 1]} : vector<128x65xf32> to vector<128x32xf32>
    %30 = vector.extract_strided_slice %28 {offsets = [0, 32], sizes = [128, 32], strides = [1, 1]} : vector<128x65xf32> to vector<128x32xf32>
    %31 = vector.extract_strided_slice %28 {offsets = [0, 64], sizes = [128, 1], strides = [1, 1]} : vector<128x65xf32> to vector<128x1xf32>
    %c112 = arith.constant 112 : index
    %c0_2 = arith.constant 0 : index
    %32 = vector.load %arg2[%c112, %c0_2] : memref<272x128xf32, #tpu.memory_space<vmem>>, vector<1x32xf32>
    %33 = vector.broadcast %32 : vector<1x32xf32> to vector<128x32xf32>
    %34 = arith.addf %30, %33 : vector<128x32xf32>
    %cst_3 = arith.constant 0.000000e+00 : f32
    %35 = vector.broadcast %cst_3 : f32 to vector<128x32xf32>
    %36 = arith.maximumf %34, %35 : vector<128x32xf32>
    %c0_4 = arith.constant 0 : index
    %c0_5 = arith.constant 0 : index
    %37 = vector.load %arg2[%c0_4, %c0_5] : memref<272x128xf32, #tpu.memory_space<vmem>>, vector<32x16xf32>
    %c120 = arith.constant 120 : index
    %c0_6 = arith.constant 0 : index
    %38 = vector.load %arg2[%c120, %c0_6] : memref<272x128xf32, #tpu.memory_space<vmem>>, vector<1x16xf32>
    %cst_7 = arith.constant dense<0.000000e+00> : vector<128x16xf32>
    %39 = tpu.matmul %36, %37, %cst_7 {dimension_numbers = #tpu.dot_dimension_numbers<[1], [0], [0], [1], [0, 0, 1, 1], [], []>} : vector<128x32xf32>, vector<32x16xf32>, vector<128x16xf32> -> vector<128x16xf32>
    %40 = vector.broadcast %38 : vector<1x16xf32> to vector<128x16xf32>
    %41 = arith.addf %39, %40 : vector<128x16xf32>
    %cst_8 = arith.constant 0.000000e+00 : f32
    %42 = vector.broadcast %cst_8 : f32 to vector<128x16xf32>
    %43 = arith.maximumf %41, %42 : vector<128x16xf32>
    %c32 = arith.constant 32 : index
    %c0_9 = arith.constant 0 : index
    %44 = vector.load %arg2[%c32, %c0_9] : memref<272x128xf32, #tpu.memory_space<vmem>>, vector<32x3xf32>
    %c136 = arith.constant 136 : index
    %c0_10 = arith.constant 0 : index
    %45 = vector.load %arg2[%c136, %c0_10] : memref<272x128xf32, #tpu.memory_space<vmem>>, vector<3x32xf32>
    %46 = vector.broadcast %31 : vector<128x1xf32> to vector<128x32xf32>
    %47 = arith.mulf %29, %46 : vector<128x32xf32>
    %48 = vector.extract_strided_slice %45 {offsets = [0, 0], sizes = [1, 32], strides = [1, 1]} : vector<3x32xf32> to vector<1x32xf32>
    %49 = vector.broadcast %48 : vector<1x32xf32> to vector<128x32xf32>
    %50 = arith.addf %47, %49 : vector<128x32xf32>
    %51 = arith.addf %50, %29 : vector<128x32xf32>
    %52 = vector.extract_strided_slice %44 {offsets = [0, 1], sizes = [32, 1], strides = [1, 1]} : vector<32x3xf32> to vector<32x1xf32>
    %cst_11 = arith.constant dense<0.000000e+00> : vector<128x1xf32>
    %53 = tpu.matmul %51, %52, %cst_11 {dimension_numbers = #tpu.dot_dimension_numbers<[1], [0], [0], [1], [0, 0, 1, 1], [], []>} : vector<128x32xf32>, vector<32x1xf32>, vector<128x1xf32> -> vector<128x1xf32>
    %54 = vector.broadcast %53 : vector<128x1xf32> to vector<128x32xf32>
    %55 = arith.mulf %29, %54 : vector<128x32xf32>
    %56 = vector.extract_strided_slice %45 {offsets = [1, 0], sizes = [1, 32], strides = [1, 1]} : vector<3x32xf32> to vector<1x32xf32>
    %57 = vector.broadcast %56 : vector<1x32xf32> to vector<128x32xf32>
    %58 = arith.addf %55, %57 : vector<128x32xf32>
    %59 = arith.addf %58, %51 : vector<128x32xf32>
    %60 = vector.extract_strided_slice %44 {offsets = [0, 2], sizes = [32, 1], strides = [1, 1]} : vector<32x3xf32> to vector<32x1xf32>
    %cst_12 = arith.constant dense<0.000000e+00> : vector<128x1xf32>
    %61 = tpu.matmul %59, %60, %cst_12 {dimension_numbers = #tpu.dot_dimension_numbers<[1], [0], [0], [1], [0, 0, 1, 1], [], []>} : vector<128x32xf32>, vector<32x1xf32>, vector<128x1xf32> -> vector<128x1xf32>
    %62 = vector.broadcast %61 : vector<128x1xf32> to vector<128x32xf32>
    %63 = arith.mulf %29, %62 : vector<128x32xf32>
    %64 = vector.extract_strided_slice %45 {offsets = [2, 0], sizes = [1, 32], strides = [1, 1]} : vector<3x32xf32> to vector<1x32xf32>
    %65 = vector.broadcast %64 : vector<1x32xf32> to vector<128x32xf32>
    %66 = arith.addf %63, %65 : vector<128x32xf32>
    %67 = arith.addf %66, %59 : vector<128x32xf32>
    %c64 = arith.constant 64 : index
    %c0_13 = arith.constant 0 : index
    %68 = vector.load %arg2[%c64, %c0_13] : memref<272x128xf32, #tpu.memory_space<vmem>>, vector<32x1xf32>
    %c96 = arith.constant 96 : index
    %c0_14 = arith.constant 0 : index
    %69 = vector.load %arg2[%c96, %c0_14] : memref<272x128xf32, #tpu.memory_space<vmem>>, vector<16x1xf32>
    %c128 = arith.constant 128 : index
    %c0_15 = arith.constant 0 : index
    %70 = vector.load %arg2[%c128, %c0_15] : memref<272x128xf32, #tpu.memory_space<vmem>>, vector<1x1xf32>
    %cst_16 = arith.constant dense<0.000000e+00> : vector<128x1xf32>
    %71 = tpu.matmul %67, %68, %cst_16 {dimension_numbers = #tpu.dot_dimension_numbers<[1], [0], [0], [1], [0, 0, 1, 1], [], []>} : vector<128x32xf32>, vector<32x1xf32>, vector<128x1xf32> -> vector<128x1xf32>
    %cst_17 = arith.constant dense<0.000000e+00> : vector<128x1xf32>
    %72 = tpu.matmul %43, %69, %cst_17 {dimension_numbers = #tpu.dot_dimension_numbers<[1], [0], [0], [1], [0, 0, 1, 1], [], []>} : vector<128x16xf32>, vector<16x1xf32>, vector<128x1xf32> -> vector<128x1xf32>
    %73 = arith.addf %71, %72 : vector<128x1xf32>
    %74 = vector.broadcast %70 : vector<1x1xf32> to vector<128x1xf32>
    %75 = arith.addf %73, %74 : vector<128x1xf32>
    %cst_18 = arith.constant 0.000000e+00 : f32
    %76 = vector.broadcast %cst_18 : f32 to vector<128x1xf32>
    %77 = arith.subf %76, %75 : vector<128x1xf32>
    %78 = math.exp %77 : vector<128x1xf32>
    %cst_19 = arith.constant 1.000000e+00 : f32
    %79 = vector.broadcast %cst_19 : f32 to vector<128x1xf32>
    %80 = arith.addf %79, %78 : vector<128x1xf32>
    %81 = tpu.reciprocal %80 {approx = true} : vector<128x1xf32> -> vector<128x1xf32>
    %c0_20 = arith.constant 0 : index
    %c0_21 = arith.constant 0 : index
    %82 = vector.load %arg3[%c0_20, %c0_21] : memref<128x1xf32, #tpu.memory_space<vmem>>, vector<128x1xf32>
    tpu.vector_store %arg3[%c0_20, %c0_21], %81 {strides = array<i32>} : memref<128x1xf32, #tpu.memory_space<vmem>>, vector<128x1xf32>,
    return
  }
  func.func @transform_0(%arg0: i32) -> (i32, i32) {
    %c0_i32 = arith.constant 0 : i32
    %c0_i32_0 = arith.constant 0 : i32
    return %arg0, %c0_i32 : i32, i32
  }
  func.func @transform_1(%arg0: i32) -> (i32, i32) {
    %c0_i32 = arith.constant 0 : i32
    %c0_i32_0 = arith.constant 0 : i32
    %c0_i32_1 = arith.constant 0 : i32
    return %c0_i32, %c0_i32_0 : i32, i32
  }
  func.func @transform_2(%arg0: i32) -> (i32, i32) {
    %c0_i32 = arith.constant 0 : i32
    %c0_i32_0 = arith.constant 0 : i32
    return %arg0, %c0_i32 : i32, i32
  }
}

</mosaic_0001>

<bundles_post_ra>
// kernel: dcn_forward.1
= control target key start
LH: loop header
LB: loop body
LE: loop exit
PB: predicated region body
PF: predicated region fallthrough
CT: control target
= control target key end

     0   :  { %7 = vsyncpa [#allocation3], 0  ;;  %s3214_s9 = smov 0   ;;  %s4095_s0 = inlined_call_operand.vmem [shape: s32[200,4], index: 0, kind: input, shape index: {}]   ;;  %s4096_s1 = inlined_call_operand.hbm [shape: f32[272,128], index: 1, kind: input, shape index: {}]   ;;  %s4097_s2 = inlined_call_operand.vmem [shape: f32[256,1], index: 2, kind: output, shape index: {}]  }
   0x1 LB: > { %s2431_s10 = sadd.s32 4294967295, %s3184_s9   ;;  %p2433_p0 = scmp.ge.s32.totalorder %s3184_s9, 1  ;;  %s3184_s9 = sphi %s3214_s9, %s13_s9  }
   0x2   : > { %p91_p1 = scmp.lt.s32.totalorder %s3184_s9, 3  ;;  %s3186_s11 = smov [#allocation2]  }
   0x3   : > { %s103_s12 = sshll.u32 %s3186_s11, 4  ;;  %p3228_p3 = scmp.eq.s32.totalorder %s2431_s10, 0  ;;  %s104_s12 = int_to_ptr.vmem [resolvable:$true] %s103_s12 }
   0x4   : > { %p3222_p2 = pnand %p2433_p0, %p91_p1  ;;  %s3146_s18 = scalar_lea.hbm %s4096_s1, 4352 }
   0x5   : > { %s4102_s14 = scalar_select %p3228_p3, 1, 0 }
   0x6   : > { %s4101_s13 = scalar_select %p3222_p2, 1, 0 }
   0x7   : > { %p2993_p4 = pneg %p3222_p2  ;;  %p3147_p6 = scmp.ne.s32.totalorder %s4096_s1, %s3146_s18 }
   0x8   : > { %p3153_p10 = scmp.lt.u32.totalorder %s3146_s18, %s4096_s1 }
   0x9   : > { %p3236_p5 = pnand %p3228_p3, %p2993_p4 }
   0xb   : > { %p3148_p7 = pneg %p3236_p5 }
   0xd   : > { %p3149_p8 = pnand %p3148_p7, %p3147_p6 }
   0xf   : > { %p3150_p9 = pneg %p3149_p8 }
  0x11   : > { %p3155_p11 = pnand %p3153_p10, %p3150_p9 }
  0x13   : > { %3158 = shalt.err (!%p3155_p11)
}
  0x14   : > { %s3159_s23 = scalar_lea.vmem %s104_s12, 4352  ;;  %p3167_p1 = scmp.lt.s32.totalorder %s104_s12, %s104_s12 }
  0x15   : > { %p3160_p12 = scmp.ne.s32.totalorder %s104_s12, %s3159_s23  ;;  %p3168_p4 = scmp.lt.s32.totalorder %s3159_s23, %s3159_s23 }
  0x17   : > { %p3162_p13 = pnand %p3160_p12, %p3148_p7  ;;  %p3169_p3 = por %p3168_p4, %p3167_p1 }
  0x19   : > { %p3163_p0 = pneg %p3162_p13 }
  0x1b   : > { %p3170_p2 = pnand %p3169_p3, %p3163_p0 }
  0x1d   : > { %3173 = shalt.err (!%p3170_p2)
}
  0x1e   : > { %s3187_s24 = smov 128   ;;  %s3188_s25 = smov 8  }
  0x1f   : > { %2996 = dma.hbm_to_vmem [thread:$0]  (!%p3236_p5), %s4096_s1, 4352, %s104_s12, [#allocation3], %s3187_s24, %s3187_s24, %s3188_s25  }
  0x20   : > { %p4104_p6 = scmp.ne.s32.totalorder %s4101_s13, 0 }
  0x21   : > { %p4105_p8 = scmp.ne.s32.totalorder (!%p4104_p6), %s4102_s14, 0 }
  0x22   : > { %136 = sbr.rel (%p4104_p6) target bundleno = 1697 (0x6a1), region = 28 }
  0x29   : > { %3179 = dma.done.wait (%p4105_p8), [#allocation3], 4352  }
  0x2a   : > { %3181 = vsyncadd (%p4105_p8), [#allocation3], 4294962944  ;;  %s3264_s28 = sshll.u32 %s2431_s10, 4  ;;  %v3189_v0 = vmov 0   ;;  %v3190_v1 = vmov 1   ;;  %v3191_v12 = vmov 2  }
  0x2b   : > { %3020 = vset.pattern.permute.xlu1 %v3189_v0  ;;  %p167_p2 = scmp.lt.s32.totalorder %s3264_s28, 24  ;;  %3021 = vset.pattern.permute.xlu0 %v3190_v1  ;;  %v3192_v16 = vmov 3   ;;  %v584_v24 = vld [vmem:[#allocation2 + $0x90] sm:$0xff]  ;;  %v585_v25 = vld [vmem:[#allocation2 + $0x98] sm:$0xff]  ;;  %v586_v27 = vld [vmem:[#allocation2 + $0xa0] sm:$0xff]  ;;  %s3195_s6 = smov 32  }
  0x2c   : > { %v2901_v26 = vpack.c.bf16 %v585_v25, %v584_v24  ;;  %v587_v28 = vld [vmem:[#allocation2 + $0xa8] sm:$0xff]  ;;  %v588_v32 = vld [vmem:[#allocation2 + $0xb0] sm:$0xff]  ;;  %v589_v33 = vld [vmem:[#allocation2 + $0xb8] sm:$0xff]  ;;  %s3196_s7 = smov 127   ;;  %s3197_s8 = smov 96  }
  0x2d   : > { %s168_s29 = scalar_select %p167_p2, %s3264_s28, 24  ;;  %v2905_v30 = vpack.c.bf16 %v587_v28, %v586_v27  ;;  %v2909_v35 = vpack.c.bf16 %v589_v33, %v588_v32  ;;  %v590_v38 = vld [vmem:[#allocation2 + $0xc0] sm:$0xff]  ;;  %v591_v39 = vld [vmem:[#allocation2 + $0xc8] sm:$0xff]  ;;  %v592_v44 = vld [vmem:[#allocation2 + $0xd0] sm:$0xff] }
  0x2e   : > { %2902 = vmatprep.subr.bf16.mxu0 %v2901_v26  ;;  %v2913_v41 = vpack.c.bf16 %v591_v39, %v590_v38  ;;  %v593_v45 = vld [vmem:[#allocation2 + $0xd8] sm:$0xff]  ;;  %v594_v49 = vld [vmem:[#allocation2 + $0xe0] sm:$0xff]  ;;  %v595_v50 = vld [vmem:[#allocation2 + $0xe8] sm:$0xff]  ;;  %s3198_s10 = smov 126   ;;  %p177_p3 = scmp.lt.s32.totalorder %s3264_s28, 31 }
  0x2f   : > { %s2439_s30 = sshll.u32 %s168_s29, 3  ;;  %2904 = vmatpush3.bf16.msra.mxu0 %v2901_v26  ;;  %v2917_v47 = vpack.c.bf16 %v593_v45, %v592_v44  ;;  %v2921_v52 = vpack.c.bf16 %v595_v50, %v594_v49  ;;  %v596_v53 = vld [vmem:[#allocation2 + $0xf0] sm:$0xff]  ;;  %v597_v54 = vld [vmem:[#allocation2 + $0xf8] sm:$0xff]  ;;  %v598_v56 = vld [vmem:[#allocation2 + $0x100] sm:$0xff] }
  0x30   : > { %s3273_s5 = scalar_lea.vmem %s4095_s0, %s2439_s30  ;;  %2906 = vmatprep.subr.bf16.mxu0 %v2905_v30  ;;  %v2925_v55 = vpack.c.bf16 %v597_v54, %v596_v53  ;;  %v599_v57 = vld [vmem:[#allocation2 + $0x108] sm:$0xff]  ;;  %s4113_s28 = smov (!%p177_p3, %s3264_s28), 31 }
  0x31   : > { %v183_v2 = vld [vmem:[%s3273_s5 + $0x8] sm:$0xff]  ;;  %v3277_v3 = vld [vmem:[%s3273_s5] sm:$0xff]  ;;  %v3280_v4 = vld [vmem:[%s3273_s5 + $0x18] sm:$0xff]  ;;  %v2929_v58 = vpack.c.bf16 %v599_v57, %v598_v56  ;;  %s2441_s11 = sshll.u32 %s4113_s28, 3 }
  0x32   : > { %204 = vperm.xlu1 %3020, %v183_v2   ;;  %v264_v5 = vadd.s32 27, %v3277_v3  ;;  %v265_v6 = vadd.s32 27, %v183_v2  ;;  %v267_v7 = vadd.s32 27, %v3280_v4  ;;  %v3285_v8 = vld [vmem:[%s3273_s5 + $0x20] sm:$0xff]  ;;  %v360_v9 = vadd.s32 56, %v3277_v3  ;;  %v3291_v11 = vld [vmem:[%s3273_s5 + $0x10] sm:$0xff]  ;;  %s4056_s14 = scalar_lea.vmem %s4097_s2, %s2441_s11 }
  0x33   : > { %v268_v10 = vadd.s32 27, %v3285_v8  ;;  %v456_v13 = vadd.s32 82, %v3277_v3  ;;  %v458_v14 = vadd.s32 82, %v3291_v11  ;;  %v3297_v15 = vld [vmem:[%s3273_s5 + $0x28] sm:$0xff]  ;;  %v457_v17 = vadd.s32 82, %v183_v2  ;;  %v3303_v19 = vld [vmem:[%s3273_s5 + $0x40] sm:$0xff]  ;;  %2908 = vmatpush3.bf16.msra.mxu0 %v2905_v30 }
  0x34   : > { %281 = vperm.xlu0 %3021, %v264_v5   ;;  %v461_v18 = vadd.s32 82, %v3297_v15  ;;  %v464_v20 = vadd.s32 82, %v3303_v19  ;;  %v266_v21 = vadd.s32 27, %v3291_v11  ;;  %v3308_v22 = vld [vmem:[%s3273_s5 + $0x58] sm:$0xff]  ;;  %v361_v29 = vadd.s32 56, %v183_v2  ;;  %2910 = vmatprep.subr.bf16.mxu0 %v2909_v35  ;;  %v3324_v42 = vld [vmem:[%s3273_s5 + $0x50] sm:$0xff] }
  0x35   : > { %v467_v23 = vadd.s32 82, %v3308_v22  ;;  %v362_v31 = vadd.s32 56, %v3291_v11  ;;  %v364_v34 = vadd.s32 56, %v3285_v8  ;;  %v3319_v36 = vld [vmem:[%s3273_s5 + $0x38] sm:$0xff]  ;;  %v363_v37 = vadd.s32 56, %v3280_v4  ;;  %v3329_v48 = vld [vmem:[%s3273_s5 + $0x68] sm:$0xff] }
  0x36   : > { %3022 = vset.pattern.permute.xlu1 %v3190_v1  ;;  %v367_v40 = vadd.s32 56, %v3319_v36  ;;  %v459_v43 = vadd.s32 82, %v3280_v4  ;;  %v370_v46 = vadd.s32 56, %v3324_v42  ;;  %v373_v51 = vadd.s32 56, %v3329_v48  ;;  %v188_v62 = vld [vmem:[%s3273_s5 + $0x30] sm:$0xff]  ;;  %v191_v2 = vld [vmem:[%s3273_s5 + $0x48] sm:$0xff] }
  0x37   : > { %284 = vperm.xlu1 %3022, %v265_v6   ;;  %2912 = vmatpush3.bf16.msra.mxu0 %v2909_v35  ;;  %v269_v59 = vadd.s32 27, %v3297_v15  ;;  %v365_v60 = vadd.s32 56, %v3297_v15  ;;  %v460_v61 = vadd.s32 82, %v3285_v8  ;;  %v3350_v63 = vld [vmem:[%s3273_s5 + $0x70] sm:$0xff]  ;;  %v271_v5 = vadd.s32 27, %v3319_v36  ;;  %v786_v56 = vld [vmem:[#allocation2] sm:$0xff] }
  0x38   : > { %290 = vperm.xlu0 %3021, %v267_v7   ;;  %2914 = vmatprep.subr.bf16.mxu0 %v2913_v41  ;;  %v274_v6 = vadd.s32 27, %v3324_v42  ;;  %v3360_v7 = vld [vmem:[%s3273_s5 + $0x78] sm:$0xff]  ;;  %v371_v25 = vadd.s32 56, %v3308_v22  ;;  %v466_v28 = vadd.s32 82, %v3324_v42  ;;  %v374_v57 = vadd.s32 56, %v3350_v63 }
  0x3b   : > { %3023 = vset.pattern.permute.xlu1 %v3191_v12  ;;  %2916 = vmatpush3.bf16.msra.mxu0 %v2913_v41 }
  0x3c   : > { %377 = vperm.xlu1 %3023, %v360_v9   ;;  %293 = vperm.xlu0 %3021, %v268_v10   ;;  %v279_v9 = vadd.s32 27, %v3360_v7  ;;  %v462_v10 = vadd.s32 82, %v188_v62 }
  0x3d   : > { %2918 = vmatprep.subr.bf16.mxu0 %v2917_v47 }
  0x3f   : > { %2920 = vmatpush3.bf16.msra.mxu0 %v2917_v47  ;;  %v198_v47 = vlaneseq }
  0x40   : > { %3024 = vset.pattern.permute.xlu1 %v3192_v16  ;;  %3030 = vset.pattern.permute.xlu0 %v3192_v16 }
  0x41   : > { %473 = vperm.xlu1 %3024, %v456_v13   ;;  %479 = vperm.xlu0 %3030, %v458_v14   ;;  %v463_v13 = vadd.s32 82, %v3319_v36  ;;  %v272_v14 = vadd.s32 27, %v3303_v19 }
  0x42   : > { %2922 = vmatprep.subr.bf16.mxu0 %v2921_v52 }
  0x43   : > { %2924 = vmatpush3.bf16.msra.mxu0 %v2921_v52  ;;  %v278_v52 = vadd.s32 27, %v3350_v63 }
  0x44   : > { %2926 = vmatprep.subr.bf16.mxu0 %v2925_v55 }
  0x45   : > { %476 = vperm.xlu1 %3024, %v457_v17   ;;  %488 = vperm.xlu0 %3030, %v461_v18   ;;  %v369_v17 = vadd.s32 56, %v191_v2  ;;  %v465_v18 = vadd.s32 82, %v191_v2 }
  0x47   : > { %2928 = vmatpush3.bf16.msra.mxu0 %v2925_v55 }
  0x48   : > { %2930 = vmatprep.subr.bf16.mxu0 %v2929_v58 }
  0x49   : > { %3025 = vset.pattern.permute.xlu1 %v3190_v1  ;;  %497 = vperm.xlu0 %3030, %v464_v20  }
  0x4a   : > { %287 = vperm.xlu1 %3025, %v266_v21  }
  0x4b   : > { %2932 = vmatpush3.bf16.msra.mxu0 %v2929_v58 }
  0x4d   : > { %506 = vperm.xlu0 %3030, %v467_v23  }
  0x4e   : > { %3026 = vset.pattern.permute.xlu1 %v3189_v0 }
  0x4f   : > { %210 = vperm.xlu1 %3026, %v3280_v4   ;;  %v273_v4 = vadd.s32 27, %v191_v2 }
  0x51   : > { %3046 = vset.pattern.permute.xlu0 %v3191_v12 }
  0x52   : > { %380 = vperm.xlu0 %3046, %v361_v29  }
  0x53   : > { %3027 = vset.pattern.permute.xlu1 %v3191_v12 }
  0x54   : > { %383 = vperm.xlu1 %3027, %v362_v31   ;;  %v194_v31 = vld [vmem:[%s3273_s5 + $0x60] sm:$0xff] }
  0x55   : > { %v372_v39 = vadd.s32 56, %v194_v31 }
  0x56   : > { %389 = vperm.xlu0 %3046, %v364_v34  }
  0x58   : > { %386 = vperm.xlu1 %3027, %v363_v37  }
  0x5a   : > { %398 = vperm.xlu0 %3046, %v367_v40  }
  0x5c   : > { %3028 = vset.pattern.permute.xlu1 %v3192_v16 }
  0x5d   : > { %482 = vperm.xlu1 %3028, %v459_v43   ;;  %v468_v43 = vadd.s32 82, %v194_v31 }
  0x5e   : > { %407 = vperm.xlu0 %3046, %v370_v46   ;;  %v469_v46 = vadd.s32 82, %v3329_v48 }
  0x61   : > { %3029 = vset.pattern.permute.xlu1 %v3189_v0 }
  0x62   : > { %213 = vperm.xlu1 %3029, %v3285_v8   ;;  %416 = vperm.xlu0 %3046, %v373_v51   ;;  %v366_v8 = vadd.s32 56, %v188_v62  ;;  %v3415_v51 = vand.u32 127, %v198_v47 }
  0x66   : > { %216 = vperm.xlu1 %3029, %v3297_v15   ;;  %3050 = vset.pattern.permute.xlu0 %v3189_v0  ;;  %v368_v15 = vadd.s32 56, %v3303_v19 }
  0x67   : > { %201 = vperm.xlu0 %3050, %v3277_v3   ;;  %v270_v3 = vadd.s32 27, %v188_v62 }
  0x6a   : > { %3031 = vset.pattern.permute.xlu1 %v3190_v1 }
  0x6b   : > { %296 = vperm.xlu1 %3031, %v269_v59   ;;  %207 = vperm.xlu0 %3050, %v3291_v11   ;;  %v470_v11 = vadd.s32 82, %v3350_v63 }
  0x6f   : > { %3032 = vset.pattern.permute.xlu1 %v3191_v12  ;;  %222 = vperm.xlu0 %3050, %v3319_v36   ;;  %v277_v36 = vadd.s32 27, %v3329_v48 }
  0x70   : > { %392 = vperm.xlu1 %3032, %v365_v60   ;;  %v3193_v60 = vmov 1.0  }
  0x73   : > { %225 = vperm.xlu0 %3050, %v3303_v19   ;;  %v275_v19 = vadd.s32 27, %v3308_v22 }
  0x74   : > { %3033 = vset.pattern.permute.xlu1 %v3192_v16 }
  0x75   : > { %485 = vperm.xlu1 %3033, %v460_v61  }
  0x77   : > { %240 = vperm.xlu0 %3050, %v3329_v48  }
  0x79   : > { %3034 = vset.pattern.permute.xlu1 %v3189_v0 }
  0x7a   : > { %219 = vperm.xlu1 %3034, %v188_v62  }
  0x7b   : > { %243 = vperm.xlu0 %3050, %v3350_v63   ;;  %v471_v63 = vadd.s32 82, %v3360_v7 }
  0x7e   : > { %3035 = vset.pattern.permute.xlu1 %v3190_v1 }
  0x7f   : > { %299 = vperm.xlu1 %3035, %v270_v3   ;;  %3052 = vset.pattern.permute.xlu0 %v3190_v1  ;;  %v2474_v3 = vld [vmem:[#allocation2 + $0x70] ss:$0 sm:$0xff] }
  0x80   : > { %308 = vperm.xlu0 %3052, %v273_v4   ;;  %v1039_v4 = vld [vmem:[#allocation2 + $0x30] sm:$0xff] }
  0x83   : > { %302 = vperm.xlu1 %3035, %v271_v5   ;;  %v1040_v5 = vld [vmem:[#allocation2 + $0x38] sm:$0xff] }
  0x84   : > { %311 = vperm.xlu0 %3052, %v274_v6   ;;  %v1037_v6 = vld [vmem:[#allocation2 + $0x20] sm:$0xff] }
  0x87   : > { %3036 = vset.pattern.permute.xlu1 %v3191_v12 }
  0x88   : > { %395 = vperm.xlu1 %3036, %v366_v8   ;;  %326 = vperm.xlu0 %3052, %v279_v9   ;;  %v3194_v8 = vmov 64  }
  0x8c   : > { %3037 = vset.pattern.permute.xlu1 %v3192_v16  ;;  %3056 = vset.pattern.permute.xlu0 %v3192_v16 }
  0x8d   : > { %491 = vperm.xlu1 %3037, %v462_v10   ;;  %515 = vperm.xlu0 %3056, %v470_v11  }
  0x91   : > { %494 = vperm.xlu1 %3037, %v463_v13   ;;  %3069 = vset.pattern.permute.xlu0 %v3194_v8 }
  0x95   : > { %3038 = vset.pattern.permute.xlu1 %v3190_v1 }
  0x96   : > { %305 = vperm.xlu1 %3038, %v272_v14  }
  0x9a   : > { %3039 = vset.pattern.permute.xlu1 %v3189_v0 }
  0x9b   : > { %228 = vperm.xlu1 %3039, %v191_v2  }
  0x9f   : > { %3040 = vset.pattern.permute.xlu1 %v3191_v12 }
  0xa0   : > { %401 = vperm.xlu1 %3040, %v368_v15  }
  0xa4   : > { %404 = vperm.xlu1 %3040, %v369_v17  }
  0xa8   : > { %3041 = vset.pattern.permute.xlu1 %v3192_v16 }
  0xa9   : > { %500 = vperm.xlu1 %3041, %v465_v18  }
  0xad   : > { %3042 = vset.pattern.permute.xlu1 %v3189_v0 }
  0xae   : > { %231 = vperm.xlu1 %3042, %v3324_v42  }
  0xb1   : > { %v205_v20 = vpop.permute.xlu1 %204 }
  0xb2   : > { %234 = vperm.xlu1 %3042, %v3308_v22   ;;  %v276_v22 = vadd.s32 27, %v194_v31  ;;  %vm249_vm2 = vcmp.eq.s32.totalorder %v3415_v51, %v205_v20 }
  0xb3   : > { %v3377_v21 = vpop.permute.xlu0 %281 }
  0xb4   : > { %vm328_vm7 = vcmp.eq.s32.totalorder %v3415_v51, %v3377_v21 }
  0xb6   : > { %v285_v23 = vpop.permute.xlu1 %284  ;;  %3043 = vset.pattern.permute.xlu1 %v3190_v1 }
  0xb7   : > { %314 = vperm.xlu1 %3043, %v275_v19   ;;  %v291_v24 = vpop.permute.xlu0 %290  ;;  %vm329_vm0 = vcmp.eq.s32.totalorder %v3415_v51, %v285_v23 }
  0xb8   : > { %vm331_vm3 = vcmp.eq.s32.totalorder %v3415_v51, %v291_v24  ;;  %vm345_vm5 = vmor %vm249_vm2, %vm329_vm0 }
  0xbb   : > { %3044 = vset.pattern.permute.xlu1 %v3191_v12  ;;  %v3383_v26 = vpop.permute.xlu1 %377  ;;  %v3385_v27 = vpop.permute.xlu0 %293 }
  0xbc   : > { %410 = vperm.xlu1 %3044, %v371_v25   ;;  %vm424_vm12 = vcmp.eq.s32.totalorder %v3415_v51, %v3383_v26 }
  0xc0   : > { %3045 = vset.pattern.permute.xlu1 %v3192_v16  ;;  %v3389_v29 = vpop.permute.xlu1 %473  ;;  %v3391_v30 = vpop.permute.xlu0 %479 }
  0xc1   : > { %503 = vperm.xlu1 %3045, %v466_v28  }
  0xc4   : > { %v477_v32 = vpop.permute.xlu1 %476  ;;  %v3394_v33 = vpop.permute.xlu0 %488 }
  0xc5   : > { %3047 = vset.pattern.permute.xlu1 %v3189_v0  ;;  %vm521_vm8 = vcmp.eq.s32.totalorder %v3415_v51, %v477_v32 }
  0xc6   : > { %237 = vperm.xlu1 %3047, %v194_v31  }
  0xc8   : > { %v3397_v34 = vpop.permute.xlu0 %497 }
  0xc9   : > { %v3399_v35 = vpop.permute.xlu1 %287 }
  0xca   : > { %3048 = vset.pattern.permute.xlu1 %v3190_v1 }
  0xcb   : > { %317 = vperm.xlu1 %3048, %v276_v22  }
  0xcc   : > { %v3403_v37 = vpop.permute.xlu0 %506 }
  0xce   : > { %v211_v38 = vpop.permute.xlu1 %210 }
  0xcf   : > { %320 = vperm.xlu1 %3048, %v277_v36   ;;  %vm251_vm4 = vcmp.eq.s32.totalorder %v3415_v51, %v211_v38 }
  0xd0   : > { %vm3429_vm9 = vmor %vm251_vm4, %vm331_vm3 }
  0xd1   : > { %v381_v40 = vpop.permute.xlu0 %380 }
  0xd2   : > { %vm425_vm1 = vcmp.eq.s32.totalorder %v3415_v51, %v381_v40 }
  0xd3   : > { %3049 = vset.pattern.permute.xlu1 %v3191_v12  ;;  %v384_v41 = vpop.permute.xlu1 %383  ;;  %vm441_vm6 = vmor %vm345_vm5, %vm425_vm1  ;;  %vm520_vm1 = vcmp.eq.s32.totalorder %v3415_v51, %v3389_v29  ;;  %vm522_vm5 = vcmp.eq.s32.totalorder %v3415_v51, %v3391_v30 }
  0xd4   : > { %413 = vperm.xlu1 %3049, %v372_v39   ;;  %vm3434_vm10 = vmor %vm441_vm6, %vm521_vm8  ;;  %vm330_vm6 = vcmp.eq.s32.totalorder %v3415_v51, %v3399_v35  ;;  %vm332_vm8 = vcmp.eq.s32.totalorder %v3415_v51, %v3385_v27 }
  0xd5   : > { %v3406_v42 = vpop.permute.xlu0 %389 }
  0xd7   : > { %v387_v44 = vpop.permute.xlu1 %386 }
  0xd8   : > { %3051 = vset.pattern.permute.xlu1 %v3192_v16  ;;  %vm427_vm13 = vcmp.eq.s32.totalorder %v3415_v51, %v387_v44 }
  0xd9   : > { %509 = vperm.xlu1 %3051, %v468_v43   ;;  %v3409_v45 = vpop.permute.xlu0 %398  ;;  %vm443_vm3 = vmor %vm3429_vm9, %vm427_vm13  ;;  %vm426_vm9 = vcmp.eq.s32.totalorder %v3415_v51, %v384_v41 }
  0xdc   : > { %v483_v49 = vpop.permute.xlu1 %482 }
  0xdd   : > { %512 = vperm.xlu1 %3051, %v469_v46   ;;  %v3412_v50 = vpop.permute.xlu0 %407  ;;  %vm523_vm15 = vcmp.eq.s32.totalorder %v3415_v51, %v483_v49 }
  0xe1   : > { %3053 = vset.pattern.permute.xlu1 %v3190_v1  ;;  %v214_v53 = vpop.permute.xlu1 %213  ;;  %v3421_v54 = vpop.permute.xlu0 %416 }
  0xe2   : > { %323 = vperm.xlu1 %3053, %v278_v52  }
  0xe5   : > { %v217_v48 = vpop.permute.xlu1 %216 }
  0xe6   : > { %3054 = vset.pattern.permute.xlu1 %v3189_v0  ;;  %v202_v55 = vpop.permute.xlu0 %201 }
  0xe7   : > { %vm248_vm11 = vcmp.eq.s32.totalorder %v3415_v51, %v202_v55  ;;  %246 = vperm.xlu1 %3054, %v3360_v7  }
  0xe8   : > { %vm344_vm14 = vmor %vm248_vm11, %vm328_vm7  ;;  %vm252_vm11 = vcmp.eq.s32.totalorder %v3415_v51, %v214_v53 }
  0xe9   : > { %vm440_vm0 = vmor %vm344_vm14, %vm424_vm12 }
  0xea   : > { %v297_v58 = vpop.permute.xlu1 %296  ;;  %v208_v59 = vpop.permute.xlu0 %207  ;;  %vm536_vm2 = vmor %vm440_vm0, %vm520_vm1  ;;  %vm253_vm1 = vcmp.eq.s32.totalorder %v3415_v51, %v217_v48 }
  0xeb   : > { %vm250_vm4 = vcmp.eq.s32.totalorder %v3415_v51, %v208_v59  ;;  %3055 = vset.pattern.permute.xlu1 %v3191_v12  ;;  %2721 = vmatprep.mubr.msk.f32.mxu0 %vm536_vm2, %v3193_v60  ;;  %vm3456_vm7 = vmor %vm443_vm3, %vm523_vm15  ;;  %v375_v12 = vadd.s32 56, %v3360_v7  ;;  %vm333_vm13 = vcmp.eq.s32.totalorder %v3415_v51, %v297_v58  ;;  %vm428_vm2 = vcmp.eq.s32.totalorder %v3415_v51, %v3406_v42  ;;  %v1038_v7 = vld [vmem:[#allocation2 + $0x28] sm:$0xff]  ;;  %v788_v58 = vld [vmem:[#allocation2 + $0x10] sm:$0xff] }
  0xec   : > { %419 = vperm.xlu1 %3055, %v374_v57   ;;  %2722 = vmatmul.mubr.msk.f32.vlgmr.msra.gmra.mrb[0].mxu0 %vm3434_vm10, %v3193_v60  ;;  %vm346_vm12 = vmor %vm250_vm4, %vm330_vm6  ;;  %vm525_vm4 = vcmp.eq.s32.totalorder %v3415_v51, %v3394_v33  ;;  %v3486_v10 = vpack.i.bf16 %v1038_v7, %v1037_v6  ;;  %v787_v57 = vld [vmem:[#allocation2 + $0x8] sm:$0xff] }
  0xed   : > { %vm442_vm14 = vmor %vm346_vm12, %vm426_vm9  ;;  %v2933_v61 = vpack.c.bf16 %v787_v57, %v786_v56 }
  0xee   : > { %vm538_vm15 = vmor %vm442_vm14, %vm522_vm5  ;;  %3059 = vrot.lane.b32.xlu0 %v3486_v10, %s3196_s7  ;;  %v223_v14 = vpop.permute.xlu0 %222 }
  0xef   : > { %v393_v62 = vpop.permute.xlu1 %392  ;;  %vm348_vm0 = vmor %vm252_vm11, %vm332_vm8  ;;  %2724 = vmatprep.mubr.msk.f32.mxu0 %vm538_vm15, %v3193_v60  ;;  %2969 = vmatprep.subr.bf16.mxu1 %v2933_v61 }
  0xf0   : > { %vm429_vm10 = vcmp.eq.s32.totalorder %v3415_v51, %v393_v62  ;;  %422 = vperm.xlu1 %3055, %v375_v12   ;;  %vm349_vm3 = vmor %vm253_vm1, %vm333_vm13  ;;  %2725 = vmatmul.mubr.msk.f32.gmra.mrb[2].mxu0 %vm3456_vm7, %v3193_v60  ;;  %vm255_vm13 = vcmp.eq.s32.totalorder %v3415_v51, %v223_v14  ;;  %v789_v12 = vld [vmem:[#allocation2 + $0x18] sm:$0xff] }
  0xf1   : > { %vm445_vm5 = vmor %vm349_vm3, %vm429_vm10  ;;  %vm431_vm3 = vcmp.eq.s32.totalorder %v3415_v51, %v3409_v45  ;;  %v2937_v62 = vpack.c.bf16 %v789_v12, %v788_v58  ;;  %2934 = vmatprep.subr.bf16.mxu0 %v2933_v61  ;;  %2971 = vmatpush3.bf16.msra.mxu1 %v2933_v61 }
  0xf2   : > { %vm444_vm6 = vmor %vm348_vm0, %vm428_vm2  ;;  %v226_v18 = vpop.permute.xlu0 %225  ;;  %2936 = vmatpush3.bf16.msra.mxu0 %v2933_v61 }
  0xf3   : > { %vm541_vm9 = vmor %vm445_vm5, %vm525_vm4  ;;  %2970 = vmatprep.subr.bf16.mxu1 %v2937_v62  ;;  %2938 = vmatprep.subr.bf16.mxu0 %v2937_v62 }
  0xf4   : > { %3057 = vset.pattern.permute.xlu1 %v3192_v16  ;;  %v486_v2 = vpop.permute.xlu1 %485  ;;  %v3484_v16 = vpack.i.bf16 %v1040_v5, %v1039_v4 }
  0xf5   : > { %vm524_vm8 = vcmp.eq.s32.totalorder %v3415_v51, %v486_v2  ;;  %518 = vperm.xlu1 %3057, %v471_v63   ;;  %2972 = vmatpush3.bf16.msra.mxu1 %v2937_v62 }
  0xf6   : > { %vm540_vm11 = vmor %vm444_vm6, %vm524_vm8  ;;  %v241_v19 = vpop.permute.xlu0 %240  ;;  %2940 = vmatpush3.bf16.msra.mxu0 %v2937_v62 }
  0xf7   : > { %2727 = vmatprep.mubr.msk.f32.mxu0 %vm540_vm11, %v3193_v60 }
  0xf8   : > { %2728 = vmatmul.mubr.msk.f32.gmra.mrb[4].mxu0 %vm541_vm9, %v3193_v60  ;;  %vm256_vm9 = vcmp.eq.s32.totalorder %v3415_v51, %v226_v18 }
  0xf9   : > { %v220_v9 = vpop.permute.xlu1 %219  ;;  %751 = vrot.lane.b32.xlu1 %v2474_v3, %s3195_s6 }
  0xfa   : > { %3068 = vset.pattern.permute.xlu1 %v3194_v8  ;;  %vm254_vm14 = vcmp.eq.s32.totalorder %v3415_v51, %v220_v9  ;;  %v3501_v24 = vpop.permute.xlu0 %243 }
  0xfd   : > { %3064 = vrot.lane.b32.xlu1 %v3484_v16, %s3196_s7 }
  0xfe   : > { %v300_v11 = vpop.permute.xlu1 %299 }
  0xff   : > { %vm334_vm7 = vcmp.eq.s32.totalorder %v3415_v51, %v300_v11  ;;  %v309_v26 = vpop.permute.xlu0 %308 }
 0x100   : > { %vm350_vm0 = vmor %vm254_vm14, %vm334_vm7  ;;  %vm528_vm7 = vcmp.eq.s32.totalorder %v3415_v51, %v3397_v34 }
 0x102   : > { %v303_v13 = vpop.permute.xlu1 %302 }
 0x103   : > { %vm335_vm12 = vcmp.eq.s32.totalorder %v3415_v51, %v303_v13  ;;  %v312_v32 = vpop.permute.xlu0 %311 }
 0x104   : > { %vm351_vm1 = vmor %vm255_vm13, %vm335_vm12 }
 0x105   : > { %vm447_vm5 = vmor %vm351_vm1, %vm431_vm3  ;;  %vm337_vm1 = vcmp.eq.s32.totalorder %v3415_v51, %v309_v26 }
 0x107   : > { %v396_v15 = vpop.permute.xlu1 %395  ;;  %v327_v41 = vpop.permute.xlu0 %326 }
 0x108   : > { %vm430_vm15 = vcmp.eq.s32.totalorder %v3415_v51, %v396_v15 }
 0x109   : > { %vm446_vm10 = vmor %vm350_vm0, %vm430_vm15 }
 0x10c   : > { %v492_v17 = vpop.permute.xlu1 %491  ;;  %v516_v43 = vpop.permute.xlu0 %515 }
 0x10d   : > { %vm526_vm2 = vcmp.eq.s32.totalorder %v3415_v51, %v492_v17 }
 0x10e   : > { %vm542_vm4 = vmor %vm446_vm10, %vm526_vm2 }
 0x10f   : > { %2730 = vmatprep.mubr.msk.f32.mxu0 %vm542_vm4, %v3193_v60 }
 0x110   : > { %v495_v20 = vpop.permute.xlu1 %494 }
 0x111   : > { %vm527_vm6 = vcmp.eq.s32.totalorder %v3415_v51, %v495_v20 }
 0x112   : > { %vm543_vm8 = vmor %vm447_vm5, %vm527_vm6 }
 0x113   : > { %2731 = vmatmul.mubr.msk.f32.gmra.mrb[6].mxu0 %vm543_vm8, %v3193_v60  ;;  %vm338_vm8 = vcmp.eq.s32.totalorder %v3415_v51, %v312_v32 }
 0x115   : > { %v306_v21 = vpop.permute.xlu1 %305 }
 0x116   : > { %vm336_vm11 = vcmp.eq.s32.totalorder %v3415_v51, %v306_v21  ;;  %v3599_v21 = vshrl.u32 %v198_v47, 7 }
 0x117   : > { %vm352_vm12 = vmor %vm256_vm9, %vm336_vm11 }
 0x11a   : > { %v229_v23 = vpop.permute.xlu1 %228 }
 0x11b   : > { %vm257_vm0 = vcmp.eq.s32.totalorder %v3415_v51, %v229_v23  ;;  %v1140_v23 = vsub.s32 0, %v3599_v21 }
 0x11c   : > { %vm353_vm2 = vmor %vm257_vm0, %vm337_vm1 }
 0x11f   : > { %v402_v25 = vpop.permute.xlu1 %401 }
 0x120   : > { %vm432_vm13 = vcmp.eq.s32.totalorder %v3415_v51, %v402_v25 }
 0x121   : > { %vm448_vm14 = vmor %vm352_vm12, %vm432_vm13 }
 0x122   : > { %vm544_vm15 = vmor %vm448_vm14, %vm528_vm7  ;;  %vm434_vm7 = vcmp.eq.s32.totalorder %v3415_v51, %v3412_v50 }
 0x123   : > { %v405_v27 = vpop.permute.xlu1 %404  ;;  %2733 = vmatprep.mubr.msk.f32.mxu0 %vm544_vm15, %v3193_v60 }
 0x124   : > { %vm433_vm10 = vcmp.eq.s32.totalorder %v3415_v51, %v405_v27 }
 0x125   : > { %vm449_vm3 = vmor %vm353_vm2, %vm433_vm10  ;;  %vm531_vm10 = vcmp.eq.s32.totalorder %v3415_v51, %v3403_v37 }
 0x128   : > { %v501_v28 = vpop.permute.xlu1 %500 }
 0x129   : > { %vm529_vm4 = vcmp.eq.s32.totalorder %v3415_v51, %v501_v28 }
 0x12a   : > { %vm545_vm5 = vmor %vm449_vm3, %vm529_vm4 }
 0x12b   : > { %2734 = vmatmul.mubr.msk.f32.gmra.mrb[8].mxu0 %vm545_vm5, %v3193_v60 }
 0x12d   : > { %v232_v29 = vpop.permute.xlu1 %231 }
 0x12e   : > { %vm258_vm6 = vcmp.eq.s32.totalorder %v3415_v51, %v232_v29 }
 0x12f   : > { %vm354_vm12 = vmor %vm258_vm6, %vm338_vm8 }
 0x130   : > { %vm450_vm0 = vmor %vm354_vm12, %vm434_vm7 }
 0x131   : > { %v235_v30 = vpop.permute.xlu1 %234 }
 0x132   : > { %vm259_vm13 = vcmp.eq.s32.totalorder %v3415_v51, %v235_v30 }
 0x136   : > { %v315_v31 = vpop.permute.xlu1 %314 }
 0x137   : > { %vm339_vm9 = vcmp.eq.s32.totalorder %v3415_v51, %v315_v31 }
 0x138   : > { %vm355_vm14 = vmor %vm259_vm13, %vm339_vm9  ;;  %vm261_vm9 = vcmp.eq.s32.totalorder %v3415_v51, %v241_v19 }
 0x13b   : > { %v411_v33 = vpop.permute.xlu1 %410 }
 0x13c   : > { %vm435_vm11 = vcmp.eq.s32.totalorder %v3415_v51, %v411_v33 }
 0x13d   : > { %vm451_vm15 = vmor %vm355_vm14, %vm435_vm11 }
 0x13e   : > { %vm547_vm3 = vmor %vm451_vm15, %vm531_vm10  ;;  %vm437_vm15 = vcmp.eq.s32.totalorder %v3415_v51, %v3421_v54 }
 0x140   : > { %v504_v22 = vpop.permute.xlu1 %503 }
 0x141   : > { %vm530_vm1 = vcmp.eq.s32.totalorder %v3415_v51, %v504_v22 }
 0x142   : > { %vm546_vm2 = vmor %vm450_vm0, %vm530_vm1 }
 0x143   : > { %2736 = vmatprep.mubr.msk.f32.mxu0 %vm546_vm2, %v3193_v60 }
 0x144   : > { %2737 = vmatmul.mubr.msk.f32.gmra.mrb[10].mxu0 %vm547_vm3, %v3193_v60  ;;  %vm262_vm3 = vcmp.eq.s32.totalorder %v3415_v51, %v3501_v24  ;;  %v3605_v24 = vld [vmem:[#allocation2 + $0x88] sm:$0x7] }
 0x145   : > { %v238_v34 = vpop.permute.xlu1 %237  ;;  %v3609_v26 = vrot.slane %v3605_v24, %v1140_v23 }
 0x146   : > { %vm260_vm6 = vcmp.eq.s32.totalorder %v3415_v51, %v238_v34 }
 0x14a   : > { %v318_v35 = vpop.permute.xlu1 %317 }
 0x14b   : > { %vm340_vm4 = vcmp.eq.s32.totalorder %v3415_v51, %v318_v35 }
 0x14c   : > { %vm356_vm11 = vmor %vm260_vm6, %vm340_vm4  ;;  %vm534_vm4 = vcmp.eq.s32.totalorder %v3415_v51, %v516_v43 }
 0x14e   : > { %v321_v36 = vpop.permute.xlu1 %320 }
 0x14f   : > { %vm341_vm5 = vcmp.eq.s32.totalorder %v3415_v51, %v321_v36 }
 0x150   : > { %vm357_vm7 = vmor %vm261_vm9, %vm341_vm5 }
 0x151   : > { %vm453_vm0 = vmor %vm357_vm7, %vm437_vm15 }
 0x153   : > { %v414_v38 = vpop.permute.xlu1 %413 }
 0x154   : > { %vm436_vm8 = vcmp.eq.s32.totalorder %v3415_v51, %v414_v38 }
 0x155   : > { %vm452_vm12 = vmor %vm356_vm11, %vm436_vm8 }
 0x158   : > { %v510_v37 = vpop.permute.xlu1 %509 }
 0x159   : > { %vm532_vm13 = vcmp.eq.s32.totalorder %v3415_v51, %v510_v37 }
 0x15a   : > { %vm548_vm14 = vmor %vm452_vm12, %vm532_vm13  ;;  %vm343_vm12 = vcmp.eq.s32.totalorder %v3415_v51, %v327_v41 }
 0x15b   : > { %2739 = vmatprep.mubr.msk.f32.mxu0 %vm548_vm14, %v3193_v60 }
 0x15c   : > { %v513_v39 = vpop.permute.xlu1 %512 }
 0x15d   : > { %vm533_vm1 = vcmp.eq.s32.totalorder %v3415_v51, %v513_v39 }
 0x15e   : > { %vm549_vm10 = vmor %vm453_vm0, %vm533_vm1  ;;  %vm843_vm1 = vcmask 261120  }
 0x15f   : > { %2740 = vmatmul.mubr.msk.f32.gmra.mrb[12].mxu0 %vm549_vm10, %v3193_v60  ;;  %vm1859_vm10 = vcmask 130048  }
 0x160   : > { %v3060_v55 = vpop.permute.xlu0 %3059 }
 0x161   : > { %v324_v40 = vpop.permute.xlu1 %323  ;;  %v3062_v59 = vunpack.i.h.bf16 %v3060_v55 }
 0x162   : > { %vm342_vm2 = vcmp.eq.s32.totalorder %v3415_v51, %v324_v40 }
 0x163   : > { %vm358_vm5 = vmor %vm262_vm3, %vm342_vm2  ;;  %vm2346_vm2 = vcmask 7168  }
 0x166   : > { %v247_v42 = vpop.permute.xlu1 %246 }
 0x167   : > { %vm263_vm11 = vcmp.eq.s32.totalorder %v3415_v51, %v247_v42 }
 0x168   : > { %vm359_vm13 = vmor %vm263_vm11, %vm343_vm12 }
 0x16b   : > { %v420_v44 = vpop.permute.xlu1 %419 }
 0x16c   : > { %vm438_vm6 = vcmp.eq.s32.totalorder %v3415_v51, %v420_v44 }
 0x16d   : > { %vm454_vm8 = vmor %vm358_vm5, %vm438_vm6 }
 0x16e   : > { %vm550_vm9 = vmor %vm454_vm8, %vm534_vm4 }
 0x16f   : > { %v423_v45 = vpop.permute.xlu1 %422  ;;  %2742 = vmatprep.mubr.msk.f32.mxu0 %vm550_vm9, %v3193_v60 }
 0x170   : > { %vm439_vm7 = vcmp.eq.s32.totalorder %v3415_v51, %v423_v45 }
 0x171   : > { %vm455_vm14 = vmor %vm359_vm13, %vm439_vm7 }
 0x174   : > { %v519_v46 = vpop.permute.xlu1 %518 }
 0x175   : > { %vm535_vm15 = vcmp.eq.s32.totalorder %v3415_v51, %v519_v46 }
 0x176   : > { %vm551_vm0 = vmor %vm455_vm14, %vm535_vm15 }
 0x177   : > { %2743 = vmatmul.mubr.msk.f32.gmra.mrb[14].mxu0 %vm551_vm0, %v3193_v60  ;;  %v3061_v60 = vunpack.i.l.bf16 %v3060_v55 }
 0x178   : > { %v3576_v4 = vpop.permute.xlu1 %751 }
 0x179   : > { %v3569_v63 = vpack.c.bf16 %v3062_v59, %v3061_v60 }
 0x17b   : > { %2942 = vmatprep.subr.bf16.mxu1 %v3569_v63 }
 0x17c   : > { %v3065_v60 = vpop.permute.xlu1 %3064 }
 0x17d   : > { %v3067_v12 = vunpack.i.h.bf16 %v3065_v60  ;;  %v3066_v62 = vunpack.i.l.bf16 %v3065_v60 }
 0x1bf   : > { %v3548_v49 = vpop.f32.mrb[0].mxu0 }
 0x1c0   : > { %1049 = vperm.xlu1 %3068, %v3548_v49   ;;  %v3551_v50 = vpop.f32.mrb[1].mxu0  ;;  %v755_v44 = vadd.f32 %v3548_v49, %v3576_v4 }
 0x1c1   : > { %1044 = vperm.xlu0 %3069, %v3551_v50   ;;  %v754_v34 = vadd.f32 %v3576_v4, %v3551_v50 }
 0x1c2   : > { %v771_v45 = vmax.f32 %v755_v44, 0.0 }
 0x1c3   : > { %v3554_v52 = vpop.f32.mrb[2].mxu0  ;;  %v770_v35 = vmax.f32 %v754_v34, 0.0 }
 0x1c4   : > { %v3556_v53 = vpop.f32.mrb[3].mxu0  ;;  %v757_v46 = vadd.f32 %v3554_v52, %v3576_v4 }
 0x1c5   : > { %1059 = vperm.xlu0 %3069, %v3554_v52   ;;  %1054 = vperm.xlu1 %3068, %v3556_v53   ;;  %v756_v36 = vadd.f32 %v3576_v4, %v3556_v53 }
 0x1c6   : > { %v773_v55 = vmax.f32 %v757_v46, 0.0 }
 0x1c7   : > { %v772_v38 = vmax.f32 %v756_v36, 0.0 }
 0x1cb   : > { %v3560_v51 = vpop.f32.mrb[4].mxu0 }
 0x1cc   : > { %v3562_v54 = vpop.f32.mrb[5].mxu0  ;;  %v759_v58 = vadd.f32 %v3560_v51, %v3576_v4 }
 0x1cd   : > { %1064 = vperm.xlu0 %3069, %v3562_v54   ;;  %v758_v56 = vadd.f32 %v3576_v4, %v3562_v54 }
 0x1ce   : > { %v775_v59 = vmax.f32 %v759_v58, 0.0 }
 0x1cf   : > { %v774_v57 = vmax.f32 %v758_v56, 0.0 }
 0x1e6   : > { %v3565_v48 = vpop.f32.mrb[6].mxu0 }
 0x1e7   : > { %v3567_v1 = vpop.f32.mrb[7].mxu0  ;;  %v761_v40 = vadd.f32 %v3565_v48, %v3576_v4 }
 0x1e8   : > { %v760_v37 = vadd.f32 %v3576_v4, %v3567_v1 }
 0x1e9   : > { %v777_v41 = vmax.f32 %v761_v40, 0.0 }
 0x1ea   : > { %v776_v39 = vmax.f32 %v760_v37, 0.0 }
 0x1fe   : > { %v3571_v2 = vpop.f32.mrb[8].mxu0 }
 0x1ff   : > { %v3573_v3 = vpop.f32.mrb[9].mxu0 }
 0x200   : > { %v762_v42 = vadd.f32 %v3576_v4, %v3573_v3 }
 0x202   : > { %v778_v43 = vmax.f32 %v762_v42, 0.0 }
 0x217   : > { %v3578_v5 = vpop.f32.mrb[10].mxu0 }
 0x218   : > { %v3580_v6 = vpop.f32.mrb[11].mxu0  ;;  %v765_v7 = vadd.f32 %v3578_v5, %v3576_v4 }
 0x219   : > { %v764_v8 = vadd.f32 %v3576_v4, %v3580_v6 }
 0x21a   : > { %v781_v9 = vmax.f32 %v765_v7, 0.0 }
 0x21b   : > { %v780_v11 = vmax.f32 %v764_v8, 0.0  ;;  %v2945_v8 = vpack.c.bf16 %v3067_v12, %v3066_v62 }
 0x21c   : > { %833 = vrot.lane.b32.xlu0 %v781_v9, %s3197_s8 }
 0x21d   : > { %831 = vrot.lane.b32.xlu1 %v780_v11, %s3197_s8 }
 0x232   : > { %v3588_v13 = vpop.f32.mrb[12].mxu0 }
 0x233   : > { %v3590_v14 = vpop.f32.mrb[13].mxu0  ;;  %v767_v15 = vadd.f32 %v3588_v13, %v3576_v4 }
 0x234   : > { %v766_v18 = vadd.f32 %v3576_v4, %v3590_v14 }
 0x235   : > { %v783_v17 = vmax.f32 %v767_v15, 0.0 }
 0x236   : > { %v782_v20 = vmax.f32 %v766_v18, 0.0 }
 0x237   : > { %837 = vrot.lane.b32.xlu1 %v783_v17, %s3197_s8 }
 0x23b   : > { %835 = vrot.lane.b32.xlu1 %v782_v20, %s3197_s8 }
 0x23f   : > { %1069 = vperm.xlu1 %3068, %v3560_v51   ;;  %v1050_v61 = vpop.permute.xlu1 %1049 }
 0x240   : > { %v3602_v19 = vpop.permute.xlu0 %1044  ;;  %v1123_v23 = vmul.f32 %v3548_v49, %v1050_v61 }
 0x241   : > { %v1122_v18 = vmul.f32 %v3602_v19, %v3551_v50 }
 0x243   : > { %1074 = vperm.xlu1 %3068, %v3567_v1  }
 0x244   : > { %v1060_v25 = vpop.permute.xlu0 %1059 }
 0x245   : > { %v1125_v27 = vmul.f32 %v3554_v52, %v1060_v25 }
 0x247   : > { %v1145_v28 = vadd.f32 %v3609_v26, %v1125_v27  ;;  %1084 = vperm.xlu1 %3068, %v3573_v3   ;;  %v1142_v27 = vadd.f32 %v3609_v26, %v1122_v18 }
 0x249   : > { %v3615_v47 = vadd.f32 %v3554_v52, %v1145_v28 }
 0x24a   : > { %v3617_v29 = vpop.f32.mrb[14].mxu0 }
 0x24b   : > { %1094 = vperm.xlu1 %3068, %v3580_v6   ;;  %v3620_v30 = vpop.f32.mrb[15].mxu0  ;;  %v769_v31 = vadd.f32 %v3617_v29, %v3576_v4 }
 0x24c   : > { %v768_v33 = vadd.f32 %v3576_v4, %v3620_v30  ;;  %v1065_v7 = vpop.permute.xlu0 %1064 }
 0x24d   : > { %v785_v32 = vmax.f32 %v769_v31, 0.0  ;;  %v1143_v31 = vadd.f32 %v3609_v26, %v1123_v23  ;;  %v1126_v34 = vmul.f32 %v1065_v7, %v3562_v54 }
 0x24e   : > { %v784_v22 = vmax.f32 %v768_v33, 0.0  ;;  %v3676_v33 = vadd.f32 %v1142_v27, %v3551_v50 }
 0x24f   : > { %1104 = vperm.xlu1 %3068, %v3590_v14   ;;  %841 = vrot.lane.b32.xlu0 %v785_v32, %s3197_s8  ;;  %v1146_v37 = vadd.f32 %v3609_v26, %v1126_v34 }
 0x251   : > { %v3699_v42 = vadd.f32 %v1146_v37, %v3562_v54 }
 0x253   : > { %1114 = vperm.xlu1 %3068, %v3620_v30   ;;  %839 = vrot.lane.b32.xlu0 %v784_v22, %s3197_s8 }
 0x257   : > { %811 = vrot.lane.b32.xlu1 %v770_v35, %s3197_s8  ;;  %1079 = vperm.xlu0 %3069, %v3565_v48   ;;  %v3685_v35 = vadd.f32 %v3548_v49, %v1143_v31 }
 0x258   : > { %3080 = vset.pattern.permute.xlu1 %v3189_v0 }
 0x25b   : > { %815 = vrot.lane.b32.xlu1 %v772_v38, %s3197_s8  ;;  %1089 = vperm.xlu0 %3069, %v3571_v2  }
 0x25f   : > { %823 = vrot.lane.b32.xlu1 %v776_v39, %s3197_s8  ;;  %1099 = vperm.xlu0 %3069, %v3578_v5  }
 0x263   : > { %825 = vrot.lane.b32.xlu1 %v777_v41, %s3197_s8  ;;  %1109 = vperm.xlu0 %3069, %v3588_v13  }
 0x267   : > { %827 = vrot.lane.b32.xlu1 %v778_v43, %s3197_s8  ;;  %1119 = vperm.xlu0 %3069, %v3617_v29  }
 0x26b   : > { %813 = vrot.lane.b32.xlu0 %v771_v45, %s3197_s8 }
 0x26c   : > { %3081 = vset.pattern.permute.xlu0 %v3189_v0  ;;  %v1055_v0 = vpop.permute.xlu1 %1054 }
 0x26d   : > { %v1124_v28 = vmul.f32 %v1055_v0, %v3556_v53 }
 0x26f   : > { %817 = vrot.lane.b32.xlu0 %v773_v55, %s3197_s8  ;;  %v1144_v22 = vadd.f32 %v3609_v26, %v1124_v28 }
 0x271   : > { %v3689_v38 = vadd.f32 %v1144_v22, %v3556_v53 }
 0x273   : > { %819 = vrot.lane.b32.xlu0 %v774_v57, %s3197_s8 }
 0x277   : > { %821 = vrot.lane.b32.xlu0 %v775_v59, %s3197_s8 }
 0x27b   : > { %3071 = vrot.lane.b32.xlu0 %v3486_v10, %s3198_s10 }
 0x27f   : > { %3076 = vrot.lane.b32.xlu0 %v3484_v16, %s3198_s10 }
 0x28e   : > { %v834_v11 = vpop.permute.xlu0 %833 }
 0x28f   : > { %v832_v9 = vpop.permute.xlu1 %831 }
 0x290   : > { %2768 = vmatprep.mubr.msk.f32.mxu1 %vm843_vm1, %v832_v9 }
 0x291   : > { %2769 = vmatmul.mubr.msk.f32.vlgmr.msra.gmra.mrb[0].mxu1 %vm843_vm1, %v834_v11 }
 0x292   : > { %2944 = vmatpush3.bf16.msra.mxu1 %v3569_v63 }
 0x293   : > { %2946 = vmatprep.subr.bf16.mxu1 %v2945_v8 }
 0x296   : > { %2948 = vmatpush3.bf16.msra.mxu1 %v2945_v8 }
 0x2a9   : > { %v838_v15 = vpop.permute.xlu1 %837 }
 0x2ad   : > { %v836_v17 = vpop.permute.xlu1 %835 }
 0x2ae   : > { %2771 = vmatprep.mubr.msk.f32.mxu1 %vm843_vm1, %v836_v17 }
 0x2af   : > { %2772 = vmatmul.mubr.msk.f32.gmra.mrb[2].mxu1 %vm843_vm1, %v838_v15 }
 0x2be   : > { %v1070_v20 = vpop.permute.xlu1 %1069 }
 0x2bf   : > { %v1127_v36 = vmul.f32 %v3560_v51, %v1070_v20 }
 0x2c1   : > { %v842_v25 = vpop.permute.xlu0 %841  ;;  %v1147_v41 = vadd.f32 %v3609_v26, %v1127_v36 }
 0x2c2   : > { %v1075_v63 = vpop.permute.xlu1 %1074 }
 0x2c3   : > { %v1128_v39 = vmul.f32 %v1075_v63, %v3567_v1  ;;  %v3707_v45 = vadd.f32 %v3560_v51, %v1147_v41 }
 0x2c5   : > { %v840_v32 = vpop.permute.xlu0 %839  ;;  %v1148_v43 = vadd.f32 %v3609_v26, %v1128_v39 }
 0x2c6   : > { %v1085_v19 = vpop.permute.xlu1 %1084  ;;  %2774 = vmatprep.mubr.msk.f32.mxu1 %vm843_vm1, %v840_v32 }
 0x2c7   : > { %2775 = vmatmul.mubr.msk.f32.gmra.mrb[4].mxu1 %vm843_vm1, %v842_v25  ;;  %v3710_v46 = vadd.f32 %v1148_v43, %v3567_v1  ;;  %v1130_v56 = vmul.f32 %v1085_v19, %v3573_v3 }
 0x2c8   : > { %2785 = vmatprep.mubr.msk.f32.mxu1 %vm843_vm1, %v3676_v33 }
 0x2c9   : > { %v1150_v60 = vadd.f32 %v3609_v26, %v1130_v56 }
 0x2ca   : > { %v1095_v40 = vpop.permute.xlu1 %1094 }
 0x2cb   : > { %2786 = vmatmul.mubr.msk.f32.vlgmr.msra.gmra.mrb[6].mxu1 %vm843_vm1, %v3685_v35  ;;  %v1132_v61 = vmul.f32 %v1095_v40, %v3580_v6  ;;  %v3727_v8 = vadd.f32 %v1150_v60, %v3573_v3 }
 0x2cc   : > { %2788 = vmatprep.mubr.msk.f32.mxu1 %vm843_vm1, %v3689_v38 }
 0x2cd   : > { %v1152_v9 = vadd.f32 %v3609_v26, %v1132_v61  ;;  %v1856_v61 = vld [vmem:[#allocation2 + $0x60] sm:$0xff] }
 0x2ce   : > { %v1105_v44 = vpop.permute.xlu1 %1104 }
 0x2cf   : > { %2789 = vmatmul.mubr.msk.f32.gmra.mrb[8].mxu1 %vm843_vm1, %v3615_v47  ;;  %v1134_v11 = vmul.f32 %v1105_v44, %v3590_v14  ;;  %v3741_v23 = vadd.f32 %v1152_v9, %v3580_v6 }
 0x2d0   : > { %2791 = vmatprep.mubr.msk.f32.mxu1 %vm843_vm1, %v3699_v42 }
 0x2d1   : > { %v1154_v25 = vadd.f32 %v3609_v26, %v1134_v11 }
 0x2d2   : > { %v1115_v55 = vpop.permute.xlu1 %1114 }
 0x2d3   : > { %2792 = vmatmul.mubr.msk.f32.gmra.mrb[10].mxu1 %vm843_vm1, %v3707_v45  ;;  %v1136_v27 = vmul.f32 %v1115_v55, %v3620_v30  ;;  %v3755_v22 = vadd.f32 %v1154_v25, %v3590_v14 }
 0x2d4   : > { %2794 = vmatprep.mubr.msk.f32.mxu1 %vm843_vm1, %v3710_v46 }
 0x2d5   : > { %v1156_v34 = vadd.f32 %v3609_v26, %v1136_v27 }
 0x2d6   : > { %v812_v57 = vpop.permute.xlu1 %811  ;;  %v1080_v58 = vpop.permute.xlu0 %1079 }
 0x2d7   : > { %v1129_v59 = vmul.f32 %v3565_v48, %v1080_v58  ;;  %2753 = vmatprep.mubr.msk.f32.mxu0 %vm843_vm1, %v812_v57  ;;  %v3768_v40 = vadd.f32 %v1156_v34, %v3620_v30 }
 0x2d9   : > { %v1149_v12 = vadd.f32 %v3609_v26, %v1129_v59 }
 0x2da   : > { %v1090_v62 = vpop.permute.xlu0 %1089  ;;  %v816_v41 = vpop.permute.xlu1 %815 }
 0x2db   : > { %v3723_v0 = vadd.f32 %v3565_v48, %v1149_v12  ;;  %v1131_v7 = vmul.f32 %v3571_v2, %v1090_v62  ;;  %v1857_v12 = vld [vmem:[#allocation2 + $0x68] sm:$0xff] }
 0x2dc   : > { %v2957_v62 = vpack.c.bf16 %v1857_v12, %v1856_v61 }
 0x2dd   : > { %v1151_v15 = vadd.f32 %v3609_v26, %v1131_v7  ;;  %2795 = vmatmul.mubr.msk.f32.gmra.mrb[12].mxu1 %vm843_vm1, %v3723_v0 }
 0x2de   : > { %v1100_v17 = vpop.permute.xlu0 %1099  ;;  %2797 = vmatprep.mubr.msk.f32.mxu1 %vm843_vm1, %v3727_v8  ;;  %v824_v57 = vpop.permute.xlu1 %823  ;;  %2958 = vmatprep.subr.bf16.mxu1 %v2957_v62 }
 0x2df   : > { %v3737_v18 = vadd.f32 %v3571_v2, %v1151_v15  ;;  %v1133_v20 = vmul.f32 %v3578_v5, %v1100_v17  ;;  %2960 = vmatpush3.bf16.msra.mxu1 %v2957_v62 }
 0x2e1   : > { %v1153_v28 = vadd.f32 %v3609_v26, %v1133_v20  ;;  %2798 = vmatmul.mubr.msk.f32.gmra.mrb[14].mxu1 %vm843_vm1, %v3737_v18 }
 0x2e2   : > { %v1110_v63 = vpop.permute.xlu0 %1109  ;;  %2800 = vmatprep.mubr.msk.f32.mxu1 %vm843_vm1, %v3741_v23  ;;  %v826_v58 = vpop.permute.xlu1 %825 }
 0x2e3   : > { %v3751_v31 = vadd.f32 %v3578_v5, %v1153_v28  ;;  %v1135_v32 = vmul.f32 %v3588_v13, %v1110_v63 }
 0x2e5   : > { %v1155_v19 = vadd.f32 %v3609_v26, %v1135_v32  ;;  %2801 = vmatmul.mubr.msk.f32.gmra.mrb[16].mxu1 %vm843_vm1, %v3751_v31 }
 0x2e6   : > { %v1120_v36 = vpop.permute.xlu0 %1119  ;;  %2803 = vmatprep.mubr.msk.f32.mxu1 %vm843_vm1, %v3755_v22  ;;  %v828_v60 = vpop.permute.xlu1 %827 }
 0x2e7   : > { %v3764_v37 = vadd.f32 %v3588_v13, %v1155_v19  ;;  %v1137_v39 = vmul.f32 %v3617_v29, %v1120_v36 }
 0x2e9   : > { %v1157_v43 = vadd.f32 %v3609_v26, %v1137_v39  ;;  %2804 = vmatmul.mubr.msk.f32.gmra.mrb[18].mxu1 %vm843_vm1, %v3764_v37 }
 0x2ea   : > { %v814_v44 = vpop.permute.xlu0 %813  ;;  %2806 = vmatprep.mubr.msk.f32.mxu1 %vm843_vm1, %v3768_v40 }
 0x2eb   : > { %v3776_v55 = vadd.f32 %v3617_v29, %v1157_v43  ;;  %2754 = vmatmul.mubr.msk.f32.vlgmr.msra.gmra.mrb[16].mxu0 %vm843_vm1, %v814_v44 }
 0x2ec   : > { %2756 = vmatprep.mubr.msk.f32.mxu0 %vm843_vm1, %v816_v41 }
 0x2ed   : > { %2807 = vmatmul.mubr.msk.f32.gmra.mrb[20].mxu1 %vm843_vm1, %v3776_v55 }
 0x2ee   : > { %v818_v56 = vpop.permute.xlu0 %817 }
 0x2ef   : > { %2757 = vmatmul.mubr.msk.f32.gmra.mrb[18].mxu0 %vm843_vm1, %v818_v56  ;;  %v763_v56 = vadd.f32 %v3571_v2, %v3576_v4 }
 0x2f2   : > { %v820_v26 = vpop.permute.xlu0 %819 }
 0x2f3   : > { %2759 = vmatprep.mubr.msk.f32.mxu0 %vm843_vm1, %v820_v26 }
 0x2f6   : > { %v822_v59 = vpop.permute.xlu0 %821 }
 0x2f7   : > { %2760 = vmatmul.mubr.msk.f32.gmra.mrb[20].mxu0 %vm843_vm1, %v822_v59 }
 0x2f8   : > { %2762 = vmatprep.mubr.msk.f32.mxu0 %vm843_vm1, %v824_v57  ;;  %v779_v57 = vmax.f32 %v763_v56, 0.0 }
 0x2fa   : > { %v3072_v17 = vpop.permute.xlu0 %3071 }
 0x2fb   : > { %2763 = vmatmul.mubr.msk.f32.gmra.mrb[22].mxu0 %vm843_vm1, %v826_v58  ;;  %v3074_v20 = vunpack.i.h.bf16 %v3072_v17  ;;  %v3073_v25 = vunpack.i.l.bf16 %v3072_v17 }
 0x2fc   : > { %2765 = vmatprep.mubr.msk.f32.mxu0 %vm843_vm1, %v828_v60 }
 0x2fd   : > { %v2949_v27 = vpack.c.bf16 %v3074_v20, %v3073_v25  ;;  %v3805_v20 = vld [vmem:[#allocation2 + $0x78] ss:$0 sm:$0xff] }
 0x2fe   : > { %v3077_v10 = vpop.permute.xlu0 %3076 }
 0x2ff   : > { %v3079_v28 = vunpack.i.h.bf16 %v3077_v10  ;;  %v3078_v16 = vunpack.i.l.bf16 %v3077_v10  ;;  %2950 = vmatprep.subr.bf16.mxu0 %v2949_v27 }
 0x300   : > { %2952 = vmatpush3.bf16.msra.mxu0 %v2949_v27 }
 0x301   : > { %v2953_v63 = vpack.c.bf16 %v3079_v28, %v3078_v16 }
 0x303   : > { %2954 = vmatprep.subr.bf16.mxu0 %v2953_v63 }
 0x304   : > { %2956 = vmatpush3.bf16.msra.mxu0 %v2953_v63 }
 0x364   : > { %v3790_v7 = vpop.f32.mrb[0].mxu1 }
 0x365   : > { %v3792_v9 = vpop.f32.mrb[1].mxu1 }
 0x382   : > { %v3794_v11 = vpop.f32.mrb[2].mxu1 }
 0x383   : > { %v3796_v15 = vpop.f32.mrb[3].mxu1 }
 0x39a   : > { %v3798_v32 = vpop.f32.mrb[4].mxu1 }
 0x39b   : > { %v3800_v34 = vpop.f32.mrb[5].mxu1 }
 0x39e   : > { %v2787_v19 = vpop.f32.mrb[6].mxu1 }
 0x39f   : > { %1390 = vperm.xlu1 %3080, %v2787_v19   ;;  %v1304_v36 = vpop.f32.mrb[7].mxu1 }
 0x3a2   : > { %v2790_v39 = vpop.f32.mrb[8].mxu1 }
 0x3a3   : > { %1385 = vperm.xlu1 %3080, %v1304_v36   ;;  %1400 = vperm.xlu0 %3081, %v2790_v39   ;;  %v1314_v41 = vpop.f32.mrb[9].mxu1 }
 0x3a6   : > { %v2793_v43 = vpop.f32.mrb[10].mxu1 }
 0x3a7   : > { %1395 = vperm.xlu1 %3080, %v1314_v41   ;;  %1410 = vperm.xlu0 %3081, %v2793_v43   ;;  %v1324_v44 = vpop.f32.mrb[11].mxu1 }
 0x3ab   : > { %1405 = vperm.xlu1 %3080, %v1324_v44  }
 0x3af   : > { %829 = vrot.lane.b32.xlu1 %v779_v57, %s3197_s8 }
 0x3b0   : > { %v2796_v26 = vpop.f32.mrb[12].mxu1 }
 0x3b1   : > { %v1334_v58 = vpop.f32.mrb[13].mxu1 }
 0x3b2   : > { %1415 = vperm.xlu0 %3081, %v1334_v58  }
 0x3b3   : > { %1420 = vperm.xlu1 %3080, %v2796_v26  }
 0x3b4   : > { %v2799_v59 = vpop.f32.mrb[14].mxu1 }
 0x3b5   : > { %v1344_v60 = vpop.f32.mrb[15].mxu1 }
 0x3b6   : > { %1425 = vperm.xlu0 %3081, %v1344_v60  }
 0x3b7   : > { %1430 = vperm.xlu1 %3080, %v2799_v59  }
 0x3b8   : > { %v2802_v61 = vpop.f32.mrb[16].mxu1 }
 0x3b9   : > { %v1354_v12 = vpop.f32.mrb[17].mxu1 }
 0x3ba   : > { %1435 = vperm.xlu0 %3081, %v1354_v12  }
 0x3bb   : > { %1440 = vperm.xlu1 %3080, %v2802_v61  }
 0x3bc   : > { %v2805_v62 = vpop.f32.mrb[18].mxu1 }
 0x3bd   : > { %v1364_v17 = vpop.f32.mrb[19].mxu1 }
 0x3be   : > { %v2755_v4 = vpop.f32.mrb[16].mxu0  ;;  %1445 = vperm.xlu0 %3081, %v1364_v17  }
 0x3bf   : > { %v948_v25 = vadd.f32 %v2755_v4, %v3805_v20  ;;  %v942_v27 = vpop.f32.mrb[17].mxu0  ;;  %1450 = vperm.xlu1 %3080, %v2805_v62  }
 0x3c0   : > { %v943_v10 = vadd.f32 %v3805_v20, %v942_v27  ;;  %v2808_v28 = vpop.f32.mrb[20].mxu1 }
 0x3c1   : > { %v1374_v16 = vpop.f32.mrb[21].mxu1  ;;  %v1022_v36 = vmax.f32 %v948_v25, 0.0 }
 0x3c2   : > { %v1021_v63 = vmax.f32 %v943_v10, 0.0  ;;  %v2758_v19 = vpop.f32.mrb[18].mxu0  ;;  %1455 = vperm.xlu0 %3081, %v1374_v16   ;;  %v1481_v16 = vsub.s32 1, %v3599_v21 }
 0x3c3   : > { %v958_v39 = vadd.f32 %v2758_v19, %v3805_v20  ;;  %v952_v41 = vpop.f32.mrb[19].mxu0  ;;  %1460 = vperm.xlu1 %3080, %v2808_v28  }
 0x3c4   : > { %v953_v43 = vadd.f32 %v3805_v20, %v952_v41  ;;  %2845 = vmatprep.mubr.msk.f32.mxu1 %vm1859_vm10, %v1021_v63 }
 0x3c5   : > { %2846 = vmatmul.mubr.msk.f32.vlgmr.msra.gmra.mrb[22].mxu1 %vm1859_vm10, %v1022_v36  ;;  %v1024_v56 = vmax.f32 %v958_v39, 0.0  ;;  %v3826_v39 = vrot.slane %v3605_v24, %v1481_v16 }
 0x3c6   : > { %v1023_v44 = vmax.f32 %v953_v43, 0.0 }
 0x3c8   : > { %2848 = vmatprep.mubr.msk.f32.mxu1 %vm1859_vm10, %v1023_v44 }
 0x3c9   : > { %2849 = vmatmul.mubr.msk.f32.gmra.mrb[24].mxu1 %vm1859_vm10, %v1024_v56 }
 0x3ca   : > { %v2761_v57 = vpop.f32.mrb[20].mxu0 }
 0x3cb   : > { %v968_v26 = vadd.f32 %v2761_v57, %v3805_v20  ;;  %v962_v58 = vpop.f32.mrb[21].mxu0 }
 0x3cc   : > { %v963_v59 = vadd.f32 %v3805_v20, %v962_v58 }
 0x3cd   : > { %v1026_v12 = vmax.f32 %v968_v26, 0.0 }
 0x3ce   : > { %v1025_v60 = vmax.f32 %v963_v59, 0.0  ;;  %v2764_v61 = vpop.f32.mrb[22].mxu0 }
 0x3cf   : > { %v978_v62 = vadd.f32 %v2764_v61, %v3805_v20  ;;  %v972_v17 = vpop.f32.mrb[23].mxu0 }
 0x3d0   : > { %v973_v4 = vadd.f32 %v3805_v20, %v972_v17  ;;  %2851 = vmatprep.mubr.msk.f32.mxu1 %vm1859_vm10, %v1025_v60 }
 0x3d1   : > { %2852 = vmatmul.mubr.msk.f32.gmra.mrb[26].mxu1 %vm1859_vm10, %v1026_v12  ;;  %v1028_v27 = vmax.f32 %v978_v62, 0.0 }
 0x3d2   : > { %v1027_v25 = vmax.f32 %v973_v4, 0.0 }
 0x3d4   : > { %2854 = vmatprep.mubr.msk.f32.mxu1 %vm1859_vm10, %v1027_v25 }
 0x3d5   : > { %2855 = vmatmul.mubr.msk.f32.gmra.mrb[28].mxu1 %vm1859_vm10, %v1028_v27 }
 0x41e   : > { %v1391_v10 = vpop.permute.xlu1 %1390 }
 0x41f   : > { %v1464_v41 = vmul.f32 %v3548_v49, %v1391_v10 }
 0x421   : > { %v1484_v57 = vadd.f32 %v3826_v39, %v1464_v41 }
 0x422   : > { %v1386_v28 = vpop.permute.xlu1 %1385  ;;  %v1401_v36 = vpop.permute.xlu0 %1400 }
 0x423   : > { %v1463_v63 = vmul.f32 %v1386_v28, %v3551_v50  ;;  %v1466_v26 = vmul.f32 %v3554_v52, %v1401_v36  ;;  %v3842_v62 = vadd.f32 %v1484_v57, %v3685_v35 }
 0x425   : > { %v1483_v43 = vadd.f32 %v3826_v39, %v1463_v63  ;;  %v1486_v17 = vadd.f32 %v3826_v39, %v1466_v26 }
 0x426   : > { %v1396_v19 = vpop.permute.xlu1 %1395  ;;  %v1411_v58 = vpop.permute.xlu0 %1410 }
 0x427   : > { %v1465_v44 = vmul.f32 %v1396_v19, %v3556_v53  ;;  %v3834_v59 = vadd.f32 %v1483_v43, %v3676_v33  ;;  %v1468_v4 = vmul.f32 %v3560_v51, %v1411_v58  ;;  %v3856_v35 = vadd.f32 %v1486_v17, %v3615_v47 }
 0x429   : > { %v1485_v60 = vadd.f32 %v3826_v39, %v1465_v44  ;;  %v1488_v16 = vadd.f32 %v3826_v39, %v1468_v4 }
 0x42a   : > { %v1406_v56 = vpop.permute.xlu1 %1405 }
 0x42b   : > { %v1467_v61 = vmul.f32 %v1406_v56, %v3562_v54  ;;  %v3847_v33 = vadd.f32 %v1485_v60, %v3689_v38  ;;  %v3870_v47 = vadd.f32 %v1488_v16, %v3707_v45 }
 0x42d   : > { %v1487_v27 = vadd.f32 %v3826_v39, %v1467_v61 }
 0x42e   : > { %v830_v12 = vpop.permute.xlu1 %829 }
 0x42f   : > { %2766 = vmatmul.mubr.msk.f32.gmra.mrb[24].mxu0 %vm843_vm1, %v830_v12  ;;  %v3861_v19 = vadd.f32 %v1487_v27, %v3699_v42 }
 0x430   : > { %2817 = vmatprep.mubr.msk.f32.mxu0 %vm843_vm1, %v3834_v59 }
 0x431   : > { %v1416_v25 = vpop.permute.xlu0 %1415 }
 0x432   : > { %v1469_v10 = vmul.f32 %v1416_v25, %v3567_v1  ;;  %v1421_v28 = vpop.permute.xlu1 %1420 }
 0x433   : > { %2818 = vmatmul.mubr.msk.f32.vlgmr.msra.gmra.mrb[26].mxu0 %vm843_vm1, %v3842_v62  ;;  %v1470_v63 = vmul.f32 %v3565_v48, %v1421_v28 }
 0x434   : > { %2820 = vmatprep.mubr.msk.f32.mxu0 %vm843_vm1, %v3847_v33  ;;  %v1489_v36 = vadd.f32 %v3826_v39, %v1469_v10 }
 0x435   : > { %v1426_v38 = vpop.permute.xlu0 %1425  ;;  %v1490_v44 = vadd.f32 %v3826_v39, %v1470_v63 }
 0x436   : > { %v1471_v41 = vmul.f32 %v1426_v38, %v3573_v3  ;;  %v1431_v43 = vpop.permute.xlu1 %1430  ;;  %v3875_v57 = vadd.f32 %v1489_v36, %v3710_v46 }
 0x437   : > { %2821 = vmatmul.mubr.msk.f32.gmra.mrb[28].mxu0 %vm843_vm1, %v3856_v35  ;;  %v1472_v56 = vmul.f32 %v3571_v2, %v1431_v43  ;;  %v3884_v45 = vadd.f32 %v1490_v44, %v3723_v0 }
 0x438   : > { %2823 = vmatprep.mubr.msk.f32.mxu0 %vm843_vm1, %v3861_v19  ;;  %v1491_v26 = vadd.f32 %v3826_v39, %v1471_v41 }
 0x439   : > { %v1436_v42 = vpop.permute.xlu0 %1435  ;;  %v1492_v61 = vadd.f32 %v3826_v39, %v1472_v56 }
 0x43a   : > { %v1473_v58 = vmul.f32 %v1436_v42, %v3580_v6  ;;  %v1441_v60 = vpop.permute.xlu1 %1440  ;;  %v3889_v17 = vadd.f32 %v1491_v26, %v3727_v8  ;;  %v1852_v26 = vld [vmem:[#allocation2 + $0x40] sm:$0xff] }
 0x43b   : > { %2824 = vmatmul.mubr.msk.f32.gmra.mrb[30].mxu0 %vm843_vm1, %v3870_v47  ;;  %v1474_v12 = vmul.f32 %v3578_v5, %v1441_v60  ;;  %v3898_v0 = vadd.f32 %v1492_v61, %v3737_v18 }
 0x43c   : > { %2826 = vmatprep.mubr.msk.f32.mxu0 %vm843_vm1, %v3875_v57  ;;  %v1493_v4 = vadd.f32 %v3826_v39, %v1473_v58  ;;  %v1854_v58 = vld [vmem:[#allocation2 + $0x50] sm:$0xff] }
 0x43d   : > { %v1446_v46 = vpop.permute.xlu0 %1445  ;;  %v1494_v10 = vadd.f32 %v3826_v39, %v1474_v12 }
 0x43e   : > { %v1475_v25 = vmul.f32 %v1446_v46, %v3590_v14  ;;  %v1451_v27 = vpop.permute.xlu1 %1450  ;;  %v3903_v16 = vadd.f32 %v1493_v4, %v3741_v23 }
 0x43f   : > { %2827 = vmatmul.mubr.msk.f32.gmra.mrb[32].mxu0 %vm843_vm1, %v3884_v45  ;;  %v1476_v28 = vmul.f32 %v3588_v13, %v1451_v27  ;;  %v3912_v18 = vadd.f32 %v1494_v10, %v3751_v31  ;;  %v998_v10 = vadd.f32 %v3790_v7, %v3805_v20 }
 0x440   : > { %2829 = vmatprep.mubr.msk.f32.mxu0 %vm843_vm1, %v3889_v17  ;;  %v1495_v63 = vadd.f32 %v3826_v39, %v1475_v25 }
 0x441   : > { %v1456_v8 = vpop.permute.xlu0 %1455  ;;  %v1496_v41 = vadd.f32 %v3826_v39, %v1476_v28 }
 0x442   : > { %v1477_v38 = vmul.f32 %v1456_v8, %v3620_v30  ;;  %v1461_v36 = vpop.permute.xlu1 %1460  ;;  %v3917_v23 = vadd.f32 %v1495_v63, %v3755_v22 }
 0x443   : > { %2830 = vmatmul.mubr.msk.f32.gmra.mrb[34].mxu0 %vm843_vm1, %v3898_v0  ;;  %v1478_v43 = vmul.f32 %v3617_v29, %v1461_v36  ;;  %v3925_v56 = vadd.f32 %v1496_v41, %v3764_v37  ;;  %v1853_v37 = vld [vmem:[#allocation2 + $0x48] sm:$0xff]  ;;  %v1032_v36 = vmax.f32 %v998_v10, 0.0  ;;  %v1008_v41 = vadd.f32 %v3794_v11, %v3805_v20 }
 0x444   : > { %2832 = vmatprep.mubr.msk.f32.mxu0 %vm843_vm1, %v3903_v16  ;;  %v1497_v44 = vadd.f32 %v3826_v39, %v1477_v38  ;;  %v2961_v60 = vpack.c.bf16 %v1853_v37, %v1852_v26  ;;  %v1003_v38 = vadd.f32 %v3805_v20, %v3796_v15  ;;  %v1018_v26 = vadd.f32 %v3798_v32, %v3805_v20 }
 0x445   : > { %v1498_v31 = vadd.f32 %v3826_v39, %v1478_v43  ;;  %v1855_v39 = vld [vmem:[#allocation2 + $0x58] sm:$0xff] }
 0x446   : > { %v3929_v42 = vadd.f32 %v1497_v44, %v3768_v40  ;;  %v2965_v61 = vpack.c.bf16 %v1855_v39, %v1854_v58  ;;  %2962 = vmatprep.subr.bf16.mxu1 %v2961_v60  ;;  %v1033_v43 = vmax.f32 %v1003_v38, 0.0  ;;  %v1013_v44 = vadd.f32 %v3805_v20, %v3800_v34 }
 0x447   : > { %2833 = vmatmul.mubr.msk.f32.gmra.mrb[36].mxu0 %vm843_vm1, %v3912_v18  ;;  %v3936_v22 = vadd.f32 %v1498_v31, %v3776_v55  ;;  %2964 = vmatpush3.bf16.msra.mxu1 %v2961_v60  ;;  %v993_v55 = vadd.f32 %v3805_v20, %v3792_v9  ;;  %v1034_v31 = vmax.f32 %v1008_v41, 0.0  ;;  %v1036_v34 = vmax.f32 %v1018_v26, 0.0 }
 0x448   : > { %2835 = vmatprep.mubr.msk.f32.mxu0 %vm843_vm1, %v3917_v23  ;;  %2966 = vmatprep.subr.bf16.mxu1 %v2965_v61  ;;  %v1035_v58 = vmax.f32 %v1013_v44, 0.0 }
 0x449   : > { %v1031_v63 = vmax.f32 %v993_v55, 0.0 }
 0x44b   : > { %2836 = vmatmul.mubr.msk.f32.gmra.mrb[38].mxu0 %vm843_vm1, %v3925_v56  ;;  %2968 = vmatpush3.bf16.msra.mxu1 %v2965_v61 }
 0x44c   : > { %2838 = vmatprep.mubr.msk.f32.mxu0 %vm843_vm1, %v3929_v42 }
 0x44f   : > { %2839 = vmatmul.mubr.msk.f32.gmra.mrb[40].mxu0 %vm843_vm1, %v3936_v22 }
 0x502   : > { %v2767_v40 = vpop.f32.mrb[24].mxu0 }
 0x503   : > { %v988_v12 = vadd.f32 %v2767_v40, %v3805_v20  ;;  %v982_v46 = vpop.f32.mrb[25].mxu0 }
 0x504   : > { %v983_v4 = vadd.f32 %v3805_v20, %v982_v46 }
 0x505   : > { %v1030_v28 = vmax.f32 %v988_v12, 0.0 }
 0x506   : > { %v1029_v25 = vmax.f32 %v983_v4, 0.0  ;;  %v2819_v27 = vpop.f32.mrb[26].mxu0  ;;  %v1818_v4 = vsub.s32 2, %v3599_v21 }
 0x507   : > { %v1641_v8 = vpop.f32.mrb[27].mxu0  ;;  %1727 = vperm.xlu1 %3080, %v2819_v27  }
 0x508   : > { %2857 = vmatprep.mubr.msk.f32.mxu1 %vm1859_vm10, %v1029_v25  ;;  %1722 = vperm.xlu0 %3081, %v1641_v8   ;;  %v3964_v25 = vrot.slane %v3605_v24, %v1818_v4 }
 0x509   : > { %2858 = vmatmul.mubr.msk.f32.gmra.mrb[30].mxu1 %vm1859_vm10, %v1030_v28 }
 0x50a   : > { %v2822_v9 = vpop.f32.mrb[28].mxu0  ;;  %2860 = vmatprep.mubr.msk.f32.mxu1 %vm1859_vm10, %v1031_v63 }
 0x50b   : > { %v1651_v7 = vpop.f32.mrb[29].mxu0  ;;  %1737 = vperm.xlu1 %3080, %v2822_v9  }
 0x50c   : > { %1732 = vperm.xlu0 %3081, %v1651_v7  }
 0x50d   : > { %2861 = vmatmul.mubr.msk.f32.gmra.mrb[32].mxu1 %vm1859_vm10, %v1032_v36 }
 0x50e   : > { %v2825_v15 = vpop.f32.mrb[30].mxu0  ;;  %2863 = vmatprep.mubr.msk.f32.mxu1 %vm1859_vm10, %v1033_v43 }
 0x50f   : > { %v1661_v37 = vpop.f32.mrb[31].mxu0  ;;  %1747 = vperm.xlu1 %3080, %v2825_v15  }
 0x510   : > { %1742 = vperm.xlu0 %3081, %v1661_v37  }
 0x511   : > { %2864 = vmatmul.mubr.msk.f32.gmra.mrb[34].mxu1 %vm1859_vm10, %v1034_v31 }
 0x512   : > { %v2828_v11 = vpop.f32.mrb[32].mxu0  ;;  %2866 = vmatprep.mubr.msk.f32.mxu1 %vm1859_vm10, %v1035_v58 }
 0x513   : > { %v1671_v60 = vpop.f32.mrb[33].mxu0  ;;  %1757 = vperm.xlu1 %3080, %v2828_v11  }
 0x514   : > { %1752 = vperm.xlu0 %3081, %v1671_v60  }
 0x515   : > { %2867 = vmatmul.mubr.msk.f32.gmra.mrb[36].mxu1 %vm1859_vm10, %v1036_v34 }
 0x516   : > { %v2831_v39 = vpop.f32.mrb[34].mxu0 }
 0x517   : > { %v1681_v61 = vpop.f32.mrb[35].mxu0  ;;  %1767 = vperm.xlu1 %3080, %v2831_v39  }
 0x518   : > { %1762 = vperm.xlu0 %3081, %v1681_v61  }
 0x51a   : > { %v2834_v32 = vpop.f32.mrb[36].mxu0 }
 0x51b   : > { %v1691_v20 = vpop.f32.mrb[37].mxu0  ;;  %1777 = vperm.xlu1 %3080, %v2834_v32  }
 0x51c   : > { %1772 = vperm.xlu0 %3081, %v1691_v20  }
 0x51e   : > { %v2837_v40 = vpop.f32.mrb[38].mxu0 }
 0x51f   : > { %v1701_v12 = vpop.f32.mrb[39].mxu0  ;;  %1787 = vperm.xlu1 %3080, %v2837_v40  }
 0x520   : > { %1782 = vperm.xlu0 %3081, %v1701_v12  }
 0x522   : > { %v2840_v46 = vpop.f32.mrb[40].mxu0 }
 0x523   : > { %1797 = vperm.xlu1 %3080, %v2840_v46   ;;  %v1711_v55 = vpop.f32.mrb[41].mxu0 }
 0x524   : > { %1792 = vperm.xlu0 %3081, %v1711_v55  }
 0x586   : > { %v1728_v27 = vpop.permute.xlu1 %1727 }
 0x587   : > { %v1801_v10 = vmul.f32 %v3548_v49, %v1728_v27  ;;  %v1723_v28 = vpop.permute.xlu0 %1722 }
 0x588   : > { %v1800_v8 = vmul.f32 %v1723_v28, %v3551_v50 }
 0x589   : > { %v1821_v63 = vadd.f32 %v3964_v25, %v1801_v10 }
 0x58a   : > { %v1820_v38 = vadd.f32 %v3964_v25, %v1800_v8  ;;  %v1738_v9 = vpop.permute.xlu1 %1737 }
 0x58b   : > { %v1803_v36 = vmul.f32 %v3554_v52, %v1738_v9  ;;  %v1733_v41 = vpop.permute.xlu0 %1732  ;;  %v1837_v24 = vadd.f32 %v1821_v63, %v3842_v62 }
 0x58c   : > { %v1836_v7 = vadd.f32 %v1820_v38, %v3834_v59  ;;  %v1802_v21 = vmul.f32 %v1733_v41, %v3556_v53 }
 0x58d   : > { %v1823_v43 = vadd.f32 %v3964_v25, %v1803_v36 }
 0x58e   : > { %v1822_v49 = vadd.f32 %v3964_v25, %v1802_v21  ;;  %v1748_v44 = vpop.permute.xlu1 %1747  ;;  %2877 = vmatprep.mubr.msk.f32.mxu1 %vm843_vm1, %v1836_v7 }
 0x58f   : > { %v1805_v50 = vmul.f32 %v3560_v51, %v1748_v44  ;;  %2878 = vmatmul.mubr.msk.f32.vlgmr.msra.gmra.mrb[22].mxu1 %vm843_vm1, %v1837_v24  ;;  %v1743_v15 = vpop.permute.xlu0 %1742  ;;  %v1839_v53 = vadd.f32 %v1823_v43, %v3856_v35 }
 0x590   : > { %v1838_v52 = vadd.f32 %v1822_v49, %v3847_v33  ;;  %v1804_v59 = vmul.f32 %v1743_v15, %v3562_v54 }
 0x591   : > { %v1825_v62 = vadd.f32 %v3964_v25, %v1805_v50 }
 0x592   : > { %v1824_v31 = vadd.f32 %v3964_v25, %v1804_v59  ;;  %v1758_v26 = vpop.permute.xlu1 %1757  ;;  %2880 = vmatprep.mubr.msk.f32.mxu1 %vm843_vm1, %v1838_v52 }
 0x593   : > { %v1807_v37 = vmul.f32 %v3565_v48, %v1758_v26  ;;  %2881 = vmatmul.mubr.msk.f32.gmra.mrb[24].mxu1 %vm843_vm1, %v1839_v53  ;;  %v1753_v51 = vpop.permute.xlu0 %1752  ;;  %v1841_v54 = vadd.f32 %v1825_v62, %v3870_v47 }
 0x594   : > { %v1840_v58 = vadd.f32 %v1824_v31, %v3861_v19  ;;  %v1806_v33 = vmul.f32 %v1753_v51, %v3567_v1 }
 0x595   : > { %v1827_v35 = vadd.f32 %v3964_v25, %v1807_v37 }
 0x596   : > { %v1826_v11 = vadd.f32 %v3964_v25, %v1806_v33  ;;  %v1768_v34 = vpop.permute.xlu1 %1767  ;;  %2883 = vmatprep.mubr.msk.f32.mxu1 %vm843_vm1, %v1840_v58 }
 0x597   : > { %v1809_v60 = vmul.f32 %v3571_v2, %v1768_v34  ;;  %2884 = vmatmul.mubr.msk.f32.gmra.mrb[26].mxu1 %vm843_vm1, %v1841_v54  ;;  %v1763_v48 = vpop.permute.xlu0 %1762  ;;  %v1843_v1 = vadd.f32 %v1827_v35, %v3884_v45 }
 0x598   : > { %v1842_v39 = vadd.f32 %v1826_v11, %v3875_v57  ;;  %v1808_v19 = vmul.f32 %v1763_v48, %v3573_v3 }
 0x599   : > { %v1829_v47 = vadd.f32 %v3964_v25, %v1809_v60 }
 0x59a   : > { %v1828_v61 = vadd.f32 %v3964_v25, %v1808_v19  ;;  %v1778_v32 = vpop.permute.xlu1 %1777  ;;  %2886 = vmatprep.mubr.msk.f32.mxu1 %vm843_vm1, %v1842_v39 }
 0x59b   : > { %v1811_v20 = vmul.f32 %v3578_v5, %v1778_v32  ;;  %2887 = vmatmul.mubr.msk.f32.gmra.mrb[28].mxu1 %vm843_vm1, %v1843_v1  ;;  %v1773_v2 = vpop.permute.xlu0 %1772  ;;  %v1845_v3 = vadd.f32 %v1829_v47, %v3898_v0 }
 0x59c   : > { %v1844_v40 = vadd.f32 %v1828_v61, %v3889_v17  ;;  %v1810_v57 = vmul.f32 %v1773_v2, %v3580_v6 }
 0x59d   : > { %v1831_v45 = vadd.f32 %v3964_v25, %v1811_v20 }
 0x59e   : > { %v1830_v12 = vadd.f32 %v3964_v25, %v1810_v57  ;;  %v1788_v46 = vpop.permute.xlu1 %1787  ;;  %2889 = vmatprep.mubr.msk.f32.mxu1 %vm843_vm1, %v1844_v40 }
 0x59f   : > { %v1813_v55 = vmul.f32 %v3588_v13, %v1788_v46  ;;  %2890 = vmatmul.mubr.msk.f32.gmra.mrb[30].mxu1 %vm843_vm1, %v1845_v3  ;;  %v1783_v5 = vpop.permute.xlu0 %1782  ;;  %v1847_v6 = vadd.f32 %v1831_v45, %v3912_v18 }
 0x5a0   : > { %v1846_v4 = vadd.f32 %v1830_v12, %v3903_v16  ;;  %v1812_v17 = vmul.f32 %v1783_v5, %v3590_v14 }
 0x5a1   : > { %v1833_v0 = vadd.f32 %v3964_v25, %v1813_v55 }
 0x5a2   : > { %v1832_v27 = vadd.f32 %v3964_v25, %v1812_v17  ;;  %v1798_v10 = vpop.permute.xlu1 %1797  ;;  %2892 = vmatprep.mubr.msk.f32.mxu1 %vm843_vm1, %v1846_v4 }
 0x5a3   : > { %v1815_v28 = vmul.f32 %v3617_v29, %v1798_v10  ;;  %2893 = vmatmul.mubr.msk.f32.gmra.mrb[32].mxu1 %vm843_vm1, %v1847_v6  ;;  %v1793_v13 = vpop.permute.xlu0 %1792  ;;  %v1849_v14 = vadd.f32 %v1833_v0, %v3925_v56 }
 0x5a4   : > { %v1848_v8 = vadd.f32 %v1832_v27, %v3917_v23  ;;  %v1814_v16 = vmul.f32 %v1793_v13, %v3620_v30  ;;  %v4030_v23 = vld [vmem:[#allocation2 + $0x80] ss:$0 sm:$0xff] }
 0x5a5   : > { %v1835_v18 = vadd.f32 %v3964_v25, %v1815_v28 }
 0x5a6   : > { %v1834_v63 = vadd.f32 %v3964_v25, %v1814_v16  ;;  %2895 = vmatprep.mubr.msk.f32.mxu1 %vm843_vm1, %v1848_v8 }
 0x5a7   : > { %2896 = vmatmul.mubr.msk.f32.gmra.mrb[34].mxu1 %vm843_vm1, %v1849_v14  ;;  %v1851_v29 = vadd.f32 %v1835_v18, %v3936_v22 }
 0x5a8   : > { %v1850_v38 = vadd.f32 %v1834_v63, %v3929_v42 }
 0x5aa   : > { %2898 = vmatprep.mubr.msk.f32.mxu1 %vm843_vm1, %v1850_v38 }
 0x5ab   : > { %2899 = vmatmul.mubr.msk.f32.gmra.mrb[36].mxu1 %vm843_vm1, %v1851_v29 }
 0x662   : > { %v2879_v30 = vpop.f32.mrb[22].mxu1 }
 0x663   : > { %v2251_v56 = vadd.f32 %v2879_v30, %v4030_v23  ;;  %v2167_v9 = vpop.f32.mrb[23].mxu1 }
 0x664   : > { %v2250_v25 = vadd.f32 %v4030_v23, %v2167_v9 }
 0x665   : > { %v2267_v36 = vsub.f32 0.0, %v2251_v56 }
 0x666   : > { %v2266_v41 = vsub.f32 0.0, %v2250_v25  ;;  %v2882_v7 = vpop.f32.mrb[24].mxu1 }
 0x667   : > { %v2284_v21 = vmul.f32 1.442695, %v2267_v36  ;;  %v2253_v42 = vadd.f32 %v2882_v7, %v4030_v23  ;;  %v2177_v24 = vpop.f32.mrb[25].mxu1 }
 0x668   : > { %v2282_v22 = vmul.f32 1.442695, %v2266_v41  ;;  %v2252_v43 = vadd.f32 %v4030_v23, %v2177_v24 }
 0x669   : > { %3082 = vpow2.f32 %v2284_v21  ;;  %v2269_v49 = vsub.f32 0.0, %v2253_v42 }
 0x66a   : > { %3084 = vpow2.f32 %v2282_v22  ;;  %v2268_v44 = vsub.f32 0.0, %v2252_v43  ;;  %v2885_v50 = vpop.f32.mrb[26].mxu1 }
 0x66b   : > { %v2288_v15 = vmul.f32 1.442695, %v2269_v49  ;;  %v2255_v52 = vadd.f32 %v2885_v50, %v4030_v23  ;;  %v2187_v59 = vpop.f32.mrb[27].mxu1 }
 0x66c   : > { %v2286_v53 = vmul.f32 1.442695, %v2268_v44  ;;  %v2254_v62 = vadd.f32 %v4030_v23, %v2187_v59 }
 0x66d   : > { %3086 = vpow2.f32 %v2288_v15  ;;  %v2271_v31 = vsub.f32 0.0, %v2255_v52 }
 0x66e   : > { %3088 = vpow2.f32 %v2286_v53  ;;  %v2270_v26 = vsub.f32 0.0, %v2254_v62  ;;  %v2888_v37 = vpop.f32.mrb[28].mxu1 }
 0x66f   : > { %v2292_v51 = vmul.f32 1.442695, %v2271_v31  ;;  %v2257_v58 = vadd.f32 %v2888_v37, %v4030_v23  ;;  %v2197_v33 = vpop.f32.mrb[29].mxu1 }
 0x670   : > { %v2290_v54 = vmul.f32 1.442695, %v2270_v26  ;;  %v2256_v35 = vadd.f32 %v4030_v23, %v2197_v33 }
 0x671   : > { %3090 = vpow2.f32 %v2292_v51  ;;  %v2273_v11 = vsub.f32 0.0, %v2257_v58 }
 0x672   : > { %3092 = vpow2.f32 %v2290_v54  ;;  %v2272_v34 = vsub.f32 0.0, %v2256_v35  ;;  %v2891_v60 = vpop.f32.mrb[30].mxu1 }
 0x673   : > { %v3083_v48 = vpop.eup %3082  ;;  %v2296_v39 = vmul.f32 1.442695, %v2273_v11  ;;  %v2259_v19 = vadd.f32 %v2891_v60, %v4030_v23  ;;  %v2207_v1 = vpop.f32.mrb[31].mxu1 }
 0x674   : > { %v3085_v47 = vpop.eup %3084  ;;  %v2315_v61 = vadd.f32 1.0, %v3083_v48  ;;  %v2294_v32 = vmul.f32 1.442695, %v2272_v34  ;;  %v2258_v20 = vadd.f32 %v4030_v23, %v2207_v1 }
 0x675   : > { %v2314_v2 = vadd.f32 1.0, %v3085_v47  ;;  %3094 = vpow2.f32 %v2296_v39  ;;  %v2275_v40 = vsub.f32 0.0, %v2259_v19 }
 0x676   : > { %3096 = vrcp.f32 %v2315_v61  ;;  %v2274_v57 = vsub.f32 0.0, %v2258_v20  ;;  %v2894_v3 = vpop.f32.mrb[32].mxu1 }
 0x677   : > { %v3087_v45 = vpop.eup %3086  ;;  %3098 = vrcp.f32 %v2314_v2  ;;  %v2300_v12 = vmul.f32 1.442695, %v2275_v40  ;;  %v2261_v46 = vadd.f32 %v2894_v3, %v4030_v23  ;;  %v2217_v55 = vpop.f32.mrb[33].mxu1 }
 0x678   : > { %v3089_v5 = vpop.eup %3088  ;;  %v2317_v4 = vadd.f32 1.0, %v3087_v45  ;;  %3100 = vpow2.f32 %v2294_v32  ;;  %v2298_v17 = vmul.f32 1.442695, %v2274_v57  ;;  %v2260_v6 = vadd.f32 %v4030_v23, %v2217_v55 }
 0x679   : > { %v2316_v0 = vadd.f32 1.0, %v3089_v5  ;;  %3102 = vpow2.f32 %v2300_v12  ;;  %v2277_v27 = vsub.f32 0.0, %v2261_v46 }
 0x67a   : > { %3104 = vrcp.f32 %v2317_v4  ;;  %v2276_v10 = vsub.f32 0.0, %v2260_v6  ;;  %v2897_v28 = vpop.f32.mrb[34].mxu1 }
 0x67b   : > { %v3091_v13 = vpop.eup %3090  ;;  %3106 = vrcp.f32 %v2316_v0  ;;  %v2304_v8 = vmul.f32 1.442695, %v2277_v27  ;;  %v2263_v16 = vadd.f32 %v2897_v28, %v4030_v23  ;;  %v2227_v14 = vpop.f32.mrb[35].mxu1 }
 0x67c   : > { %v3093_v18 = vpop.eup %3092  ;;  %v2319_v63 = vadd.f32 1.0, %v3091_v13  ;;  %3108 = vpow2.f32 %v2298_v17  ;;  %v2302_v38 = vmul.f32 1.442695, %v2276_v10  ;;  %v2262_v29 = vadd.f32 %v4030_v23, %v2227_v14 }
 0x67d   : > { %v2318_v30 = vadd.f32 1.0, %v3093_v18  ;;  %3110 = vpow2.f32 %v2304_v8  ;;  %v2279_v56 = vsub.f32 0.0, %v2263_v16 }
 0x67e   : > { %3112 = vrcp.f32 %v2319_v63  ;;  %v2278_v9 = vsub.f32 0.0, %v2262_v29  ;;  %v2900_v25 = vpop.f32.mrb[36].mxu1 }
 0x67f   : > { %v3095_v36 = vpop.eup %3094  ;;  %3114 = vrcp.f32 %v2318_v30  ;;  %v2308_v41 = vmul.f32 1.442695, %v2279_v56  ;;  %v2265_v7 = vadd.f32 %v2900_v25, %v4030_v23  ;;  %v2237_v21 = vpop.f32.mrb[37].mxu1 }
 0x680   : > { %v3097_v42 = vpop.eup %3096  ;;  %v2321_v24 = vadd.f32 1.0, %v3095_v36  ;;  %3116 = vpow2.f32 %v2302_v38  ;;  %v2306_v22 = vmul.f32 1.442695, %v2278_v9  ;;  %v2264_v43 = vadd.f32 %v4030_v23, %v2237_v21 }
 0x681   : > { %v3099_v49 = vpop.eup %3098  ;;  %2348 = vst.msk [vmem:[%s4056_s14 + $0x8] sm:$0xff] %vm2346_vm2, %v3097_v42  ;;  %3118 = vpow2.f32 %v2308_v41  ;;  %v2281_v44 = vsub.f32 0.0, %v2265_v7 }
 0x682   : > { %v3101_v50 = vpop.eup %3100  ;;  %2347 = vst.msk [vmem:[%s4056_s14] sm:$0xff] %vm2346_vm2, %v3099_v49  ;;  %3120 = vrcp.f32 %v2321_v24  ;;  %v2280_v15 = vsub.f32 0.0, %v2264_v43 }
 0x683   : > { %v3103_v52 = vpop.eup %3102  ;;  %v2320_v59 = vadd.f32 1.0, %v3101_v50  ;;  %3122 = vpow2.f32 %v2306_v22  ;;  %v2312_v53 = vmul.f32 1.442695, %v2281_v44 }
 0x684   : > { %v3105_v62 = vpop.eup %3104  ;;  %v2323_v31 = vadd.f32 1.0, %v3103_v52  ;;  %v2310_v23 = vmul.f32 1.442695, %v2280_v15 }
 0x685   : > { %v3107_v26 = vpop.eup %3106  ;;  %2350 = vst.msk [vmem:[%s4056_s14 + $0x18] sm:$0xff] %vm2346_vm2, %v3105_v62  ;;  %3124 = vrcp.f32 %v2320_v59 }
 0x686   : > { %v3109_v37 = vpop.eup %3108  ;;  %2349 = vst.msk [vmem:[%s4056_s14 + $0x10] sm:$0xff] %vm2346_vm2, %v3107_v26  ;;  %3126 = vrcp.f32 %v2323_v31 }
 0x687   : > { %v3111_v51 = vpop.eup %3110  ;;  %v2322_v58 = vadd.f32 1.0, %v3109_v37  ;;  %3128 = vpow2.f32 %v2312_v53 }
 0x688   : > { %v3113_v33 = vpop.eup %3112  ;;  %v2325_v54 = vadd.f32 1.0, %v3111_v51  ;;  %3130 = vpow2.f32 %v2310_v23 }
 0x689   : > { %v3115_v35 = vpop.eup %3114  ;;  %2352 = vst.msk [vmem:[%s4056_s14 + $0x28] sm:$0xff] %vm2346_vm2, %v3113_v33  ;;  %3132 = vrcp.f32 %v2322_v58 }
 0x68a   : > { %v3117_v11 = vpop.eup %3116  ;;  %2351 = vst.msk [vmem:[%s4056_s14 + $0x20] sm:$0xff] %vm2346_vm2, %v3115_v35  ;;  %3134 = vrcp.f32 %v2325_v54 }
 0x68b   : > { %v3119_v34 = vpop.eup %3118  ;;  %v2324_v60 = vadd.f32 1.0, %v3117_v11 }
 0x68c   : > { %v3121_v48 = vpop.eup %3120  ;;  %v2327_v39 = vadd.f32 1.0, %v3119_v34 }
 0x68d   : > { %v3123_v19 = vpop.eup %3122  ;;  %2354 = vst.msk [vmem:[%s4056_s14 + $0x38] sm:$0xff] %vm2346_vm2, %v3121_v48  ;;  %3136 = vrcp.f32 %v2324_v60 }
 0x68e   : > { %3138 = vrcp.f32 %v2327_v39  ;;  %v2326_v1 = vadd.f32 1.0, %v3123_v19 }
 0x68f   : > { %v3125_v47 = vpop.eup %3124 }
 0x690   : > { %v3127_v61 = vpop.eup %3126  ;;  %2353 = vst.msk [vmem:[%s4056_s14 + $0x30] sm:$0xff] %vm2346_vm2, %v3125_v47  ;;  %3140 = vrcp.f32 %v2326_v1 }
 0x691   : > { %v3129_v32 = vpop.eup %3128  ;;  %2356 = vst.msk [vmem:[%s4056_s14 + $0x48] sm:$0xff] %vm2346_vm2, %v3127_v61 }
 0x692   : > { %v3131_v20 = vpop.eup %3130  ;;  %v2329_v2 = vadd.f32 1.0, %v3129_v32 }
 0x693   : > { %v3133_v40 = vpop.eup %3132  ;;  %v2328_v57 = vadd.f32 1.0, %v3131_v20 }
 0x694   : > { %v3135_v3 = vpop.eup %3134  ;;  %2355 = vst.msk [vmem:[%s4056_s14 + $0x40] sm:$0xff] %vm2346_vm2, %v3133_v40  ;;  %3142 = vrcp.f32 %v2329_v2 }
 0x695   : > { %2358 = vst.msk [vmem:[%s4056_s14 + $0x58] sm:$0xff] %vm2346_vm2, %v3135_v3  ;;  %3144 = vrcp.f32 %v2328_v57 }
 0x697   : > { %v3137_v45 = vpop.eup %3136 }
 0x698   : > { %v3139_v12 = vpop.eup %3138  ;;  %2357 = vst.msk [vmem:[%s4056_s14 + $0x50] sm:$0xff] %vm2346_vm2, %v3137_v45 }
 0x699   : > { %2360 = vst.msk [vmem:[%s4056_s14 + $0x68] sm:$0xff] %vm2346_vm2, %v3139_v12 }
 0x69a   : > { %v3141_v46 = vpop.eup %3140 }
 0x69b   : > { %2359 = vst.msk [vmem:[%s4056_s14 + $0x60] sm:$0xff] %vm2346_vm2, %v3141_v46 }
 0x69e   : > { %v3143_v55 = vpop.eup %3142 }
 0x69f   : > { %v3145_v5 = vpop.eup %3144  ;;  %2362 = vst.msk [vmem:[%s4056_s14 + $0x78] sm:$0xff] %vm2346_vm2, %v3143_v55 }
 0x6a0   : > { %2361 = vst.msk [vmem:[%s4056_s14 + $0x70] sm:$0xff] %vm2346_vm2, %v3145_v5 }
 0x6a1 PF: > { %s13_s9 = sadd.s32 1, %s3184_s9  }
 0x6a2   : > { %p10_p5 = scmp.ge.s32.totalorder %s13_s9, 4  }
 0x6a4   :  { %12 = sbr.rel (!%p10_p5) target bundleno = 1 (0x1), region = 63 }
 0x6ab   :  { %2385 = vsyncpa [#allocation3], 1 }
 0x6ac   :  { %2387 = vsyncpa [#allocation3 + $0x1], 1 }

</bundles_post_ra>
